<compile_context>
chip_gen: v7x
topology: tpu7x:2x2x1
jax: 0.10.0
libtpu: 0.0.40
codegen_flags: <defaults>
</compile_context>

<pallas_src>
import functools

import jax
import jax.numpy as jnp
from jax.experimental import pallas as pl
from jax.experimental.pallas import tpu as pltpu

EPS = 1e-5


def _round_up(x, m):
    return (x + m - 1) // m * m


# --------------------------- per-generation tuning ---------------------------

@functools.lru_cache(maxsize=None)
def _tpu_config():
    """Generation-dependent output-tile width / VMEM budget.

    v6e/v7x: 256-wide MXU -> TN=256.  v5e: 128-wide MXU -> TN=128.
    VMEM limit: generous on 128 MiB parts (v5e/v6e), conservative on v7x (64 MiB/TC).
    """
    kind = ""
    try:
        kind = (jax.devices()[0].device_kind or "").lower()
    except Exception:
        pass
    if "v5 lite" in kind or "v5e" in kind or "v5litepod" in kind:
        tn, limit = 128, 64 << 20
    elif "v7" in kind:
        tn, limit = 256, 40 << 20
    elif "v6" in kind:
        tn, limit = 256, 64 << 20
    else:                       # unknown backend (e.g. interpret/CPU): safe middle
        tn, limit = 256, 48 << 20
    try:                        # cap against the actual part when queryable
        cap = int(pltpu.get_tpu_info().vmem_capacity_bytes)
        limit = min(limit, (cap * 3) // 4)
    except Exception:
        pass
    return {"tn": tn, "vmem_limit": limit}


# ----------------------------- Pallas kernels --------------------------------

def _accum_3x3_taps(x_ref, w_ref, *, stride, ho, wo):
    """sum_tap  x[tap window] @ w[tap], f32 accumulation.

    x_ref : (s*s, Hph, Wph, Cin)   phase-split, spatially padded activation tile.
    w_ref : (9, Cin, TN)           per-tap weight tile (BN scale pre-folded).
    Tap (i, j) of a stride-s 3x3 conv reads phase (i%s, j%s) at offset (i//s, j//s),
    so every tap is an unstrided in-VMEM slice -> no im2col materialized in HBM.
    """
    s = stride
    cin = x_ref.shape[-1]
    tn = w_ref.shape[-1]
    acc = jnp.zeros((ho * wo, tn), jnp.float32)
    for i in range(3):
        for j in range(3):
            ph = (i % s) * s + (j % s)
            di, dj = i // s, j // s
            tap = x_ref[ph, di:di + ho, dj:dj + wo, :].reshape(ho * wo, cin)
            acc = acc + jnp.dot(tap, w_ref[i * 3 + j],
                                preferred_element_type=jnp.float32)
    return acc


def _conv_bn_relu_kernel(x_ref, w_ref, b_ref, o_ref, *, stride, ho, wo):
    """o = relu(conv3x3(x) * bn_scale + bn_bias)   (scale folded into w)."""
    acc = _accum_3x3_taps(x_ref, w_ref, stride=stride, ho=ho, wo=wo)
    y = jnp.maximum(acc + b_ref[...], 0.0)
    o_ref[...] = y.reshape(o_ref.shape).astype(o_ref.dtype)


def _conv_bn_add_relu_kernel(x_ref, w_ref, b_ref, r_ref, o_ref, *, stride, ho, wo):
    """o = relu(conv3x3(x) + bn_bias + residual)   (identity shortcut, bf16 r)."""
    acc = _accum_3x3_taps(x_ref, w_ref, stride=stride, ho=ho, wo=wo)
    res = r_ref[0].reshape(ho * wo, r_ref.shape[-1]).astype(jnp.float32)
    y = jnp.maximum(acc + b_ref[...] + res, 0.0)
    o_ref[...] = y.reshape(o_ref.shape).astype(o_ref.dtype)


def _conv_bn_proj_relu_kernel(x_ref, w_ref, b_ref, sx_ref, sw_ref, sb_ref, o_ref,
                              *, stride, ho, wo):
    """o = relu(conv3x3(x) + bn_bias + sx @ sw + sb)  (projection shortcut fused
    as a 10th accumulated dot on the same tile)."""
    acc = _accum_3x3_taps(x_ref, w_ref, stride=stride, ho=ho, wo=wo)
    sx = sx_ref[0].reshape(ho * wo, sx_ref.shape[-1])
    acc = acc + jnp.dot(sx, sw_ref[...], preferred_element_type=jnp.float32)
    y = jnp.maximum(acc + b_ref[...] + sb_ref[...], 0.0)
    o_ref[...] = y.reshape(o_ref.shape).astype(o_ref.dtype)


# ------------------------- pallas_call wrapper --------------------------------

def _fused_conv(xph, w_taps, bias, *, ss, stride, ho, wo, out_dtype,
                residual=None, shortcut=None):
    """One fused conv3x3+BN(+shortcut)+ReLU pallas_call.

    xph    : [N*ss, Hph, Wph, Cin] bf16 phase-split padded activation.
    w_taps : [9, Cin, Cout_pad]    bf16 per-tap weights (BN scale folded).
    bias   : [1, Cout_pad]         f32 folded BN bias.
    """
    nss, hph, wph, cin = xph.shape
    n = nss // ss
    cout_pad = w_taps.shape[-1]

    cfg = _tpu_config()
    tn = cfg["tn"] if cout_pad % cfg["tn"] == 0 else 128
    # v7x: make sure the parallel grid has >= 2 tiles to feed both TensorCores.
    if n * (cout_pad // tn) < 2 and tn > 128:
        tn //= 2
    grid = (n, cout_pad // tn)

    in_specs = [
        pl.BlockSpec((ss, hph, wph, cin), lambda i, j: (i, 0, 0, 0)),
        pl.BlockSpec((9, w_taps.shape[1], tn), lambda i, j: (0, 0, j)),
        pl.BlockSpec((1, tn), lambda i, j: (0, j)),
    ]
    operands = [xph, w_taps, bias]
    flops = 2 * n * ho * wo * 9 * w_taps.shape[1] * cout_pad
    extra_bytes = 0

    if shortcut is not None:
        sx, sw, sb = shortcut
        in_specs += [
            pl.BlockSpec((1, ho, wo, sx.shape[-1]), lambda i, j: (i, 0, 0, 0)),
            pl.BlockSpec((sw.shape[0], tn), lambda i, j: (0, j)),
            pl.BlockSpec((1, tn), lambda i, j: (0, j)),
        ]
        operands += [sx, sw, sb]
        kernel = functools.partial(_conv_bn_proj_relu_kernel,
                                   stride=stride, ho=ho, wo=wo)
        flops += 2 * n * ho * wo * sw.shape[0] * cout_pad
        extra_bytes = int(sx.size * sx.dtype.itemsize + sw.size * 2 + sb.size * 4)
    elif residual is not None:
        in_specs += [pl.BlockSpec((1, ho, wo, tn), lambda i, j: (i, 0, 0, j))]
        operands += [residual]
        kernel = functools.partial(_conv_bn_add_relu_kernel,
                                   stride=stride, ho=ho, wo=wo)
        extra_bytes = int(residual.size * residual.dtype.itemsize)
    else:
        kernel = functools.partial(_conv_bn_relu_kernel,
                                   stride=stride, ho=ho, wo=wo)

    cost = pl.CostEstimate(
        flops=int(flops), transcendentals=0,
        bytes_accessed=int(xph.size * xph.dtype.itemsize
                           + w_taps.size * 2 + bias.size * 4
                           + n * ho * wo * cout_pad * jnp.dtype(out_dtype).itemsize
                           + extra_bytes))

    return pl.pallas_call(
        kernel,
        out_shape=jax.ShapeDtypeStruct((n, ho, wo, cout_pad), out_dtype),
        grid=grid,
        in_specs=in_specs,
        out_specs=pl.BlockSpec((1, ho, wo, tn), lambda i, j: (i, 0, 0, j)),
        compiler_params=pltpu.CompilerParams(
            dimension_semantics=("parallel", "parallel"),
            vmem_limit_bytes=cfg["vmem_limit"]),
        cost_estimate=cost,
    )(*operands)


# --------------------------------- JAX glue -----------------------------------

def _phase_split(x_nhwc, stride):
    """Zero-pad spatially by 1 and split into stride*stride phases so every 3x3 tap
    becomes an unstrided slice inside the kernel.  ~1x HBM pass (vs 9x im2col).
    Returns ([N*s*s, Hph, Wph, C], s*s)."""
    n, h, w, c = x_nhwc.shape
    xp = jnp.pad(x_nhwc, ((0, 0), (1, 1), (1, 1), (0, 0)))
    if stride == 1:
        return xp, 1
    s = stride
    hp, wp = _round_up(h + 2, s), _round_up(w + 2, s)
    if (hp, wp) != (h + 2, w + 2):
        xp = jnp.pad(xp, ((0, 0), (0, hp - (h + 2)), (0, wp - (w + 2)), (0, 0)))
    phases = [xp[:, pi::s, pj::s, :] for pi in range(s) for pj in range(s)]
    xph = jnp.stack(phases, axis=1)                    # [n, s*s, hp//s, wp//s, c]
    return xph.reshape(n * s * s, hp // s, wp // s, c), s * s


def _fold_bn(bn):
    gamma, beta, mean, var = bn
    scale = gamma / jnp.sqrt(var + EPS)
    return scale, beta - mean * scale


def _prep_conv3_weights(w_oihw, bn, cin_pad, cout_pad):
    """[O,I,3,3] -> per-tap [9, cin_pad, cout_pad] bf16 with BN scale folded,
    plus the folded bias [1, cout_pad] f32.  Zero padding keeps padded lanes exact."""
    scale, bias = _fold_bn(bn)
    cout, cin = w_oihw.shape[0], w_oihw.shape[1]
    w = jnp.transpose(w_oihw, (2, 3, 1, 0)).reshape(9, cin, cout)
    w = w * scale[None, None, :]
    w = jnp.pad(w, ((0, 0), (0, cin_pad - cin), (0, cout_pad - cout)))
    b = jnp.pad(bias, (0, cout_pad - cout)).reshape(1, cout_pad)
    return w.astype(jnp.bfloat16), b.astype(jnp.float32)


def _prep_conv1_weights(w_oihw, bn, cout_pad):
    """1x1 projection shortcut: [O,I,1,1] -> [I, cout_pad] bf16 + bias [1, cout_pad]."""
    scale, bias = _fold_bn(bn)
    cout, cin = w_oihw.shape[0], w_oihw.shape[1]
    w = jnp.transpose(w_oihw, (2, 3, 1, 0)).reshape(cin, cout) * scale[None, :]
    w = jnp.pad(w, ((0, 0), (0, cout_pad - cout)))
    b = jnp.pad(bias, (0, cout_pad - cout)).reshape(1, cout_pad)
    return w.astype(jnp.bfloat16), b.astype(jnp.float32)


def basic_block_forward(x_nchw, params, stride, downsample):
    """BasicBlock forward (inference BN).  Input/output NCHW f32."""
    x = jnp.transpose(x_nchw, (0, 2, 3, 1)).astype(jnp.float32)      # NHWC
    x_bf = x.astype(jnp.bfloat16)
    n, h, w, cin = x.shape

    c1 = params["w1"].shape[0]
    cexp = params["w2"].shape[0]
    c1_pad = _round_up(c1, 128)          # lane-dense K_A output / K_B input
    cexp_pad = _round_up(cexp, 128)      # lane-dense final output channels

    ho = (h + 2 - 3) // stride + 1
    wo = (w + 2 - 3) // stride + 1

    # --- conv1 3x3 (stride) + BN1 + ReLU: in-kernel tap gather, bf16 output ----
    xph1, ss1 = _phase_split(x_bf, stride)
    w1, b1 = _prep_conv3_weights(params["w1"], params["bn1"], cin, c1_pad)
    y1 = _fused_conv(xph1, w1, b1, ss=ss1, stride=stride, ho=ho, wo=wo,
                     out_dtype=jnp.bfloat16)           # [n, ho, wo, c1_pad]

    # --- conv2 3x3 (stride 1) + BN2 + shortcut + ReLU --------------------------
    # conv2 weights have their input dim padded to c1_pad with zero rows, so the
    # (exactly-zero) padded channels of y1 never need to be sliced off.
    xph2, ss2 = _phase_split(y1, 1)
    w2, b2 = _prep_conv3_weights(params["w2"], params["bn2"], c1_pad, cexp_pad)

    if downsample:
        sx = x_bf[:, ::stride, ::stride, :][:, :ho, :wo, :]   # 1x1-conv taps
        ws, bs = _prep_conv1_weights(params["ws"], params["bns"], cexp_pad)
        out = _fused_conv(xph2, w2, b2, ss=ss2, stride=1, ho=ho, wo=wo,
                          out_dtype=jnp.float32, shortcut=(sx, ws, bs))
    else:
        if stride != 1 or cin != cexp:
            raise ValueError("identity shortcut requires stride == 1 and "
                             "Cin == Cout*expansion")
        r = x_bf                                           # bf16 residual stream
        if cexp_pad != cexp:
            r = jnp.pad(r, ((0, 0), (0, 0), (0, 0), (0, cexp_pad - cexp)))
        out = _fused_conv(xph2, w2, b2, ss=ss2, stride=1, ho=ho, wo=wo,
                          out_dtype=jnp.float32, residual=r)

    if cexp_pad != cexp:
        out = out[..., :cexp]
    # TODO(synk): when chaining blocks, stay bf16 NHWC and skip this transpose.
    return jnp.transpose(out, (0, 3, 1, 2))                # -> NCHW


# ----------------------------- pure-JAX reference ------------------------------

def _conv_ref(x, w, stride, pad):
    return jax.lax.conv_general_dilated(
        x, w, (stride, stride), ((pad, pad), (pad, pad)),
        dimension_numbers=("NCHW", "OIHW", "NCHW"))


def _bn_ref(x, gamma, beta, mean, var):
    return ((x - mean[None, :, None, None])
            / jnp.sqrt(var[None, :, None, None] + EPS)
            * gamma[None, :, None, None] + beta[None, :, None, None])


def basic_block_ref(x, params, stride, downsample):
    y = _conv_ref(x, params["w1"], stride, 1)
    y = jnp.maximum(_bn_ref(y, *params["bn1"]), 0.0)
    y = _conv_ref(y, params["w2"], 1, 1)
    y = _bn_ref(y, *params["bn2"])
    if downsample:
        s = _conv_ref(x, params["ws"], stride, 0)
        s = _bn_ref(s, *params["bns"])
    else:
        s = x
    return jnp.maximum(y + s, 0.0)


# ------------------------------------ main ------------------------------------

def _make_params(key, in_channel, out_channel, expansion, downsample):
    cexp = out_channel * expansion
    ks = jax.random.split(key, 16)

    def bn(keys, c):
        k0, k1, k2, k3 = keys
        return (1.0 + 0.1 * jax.random.normal(k0, (c,)),
                0.1 * jax.random.normal(k1, (c,)),
                0.1 * jax.random.normal(k2, (c,)),
                jax.random.uniform(k3, (c,), minval=0.5, maxval=1.5))

    params = {
        "w1": 0.1 * jax.random.normal(ks[0], (out_channel, in_channel, 3, 3),
                                      jnp.float32),
        "bn1": bn(ks[1:5], out_channel),
        "w2": 0.1 * jax.random.normal(ks[5], (cexp, out_channel, 3, 3),
                                      jnp.float32),
        "bn2": bn(ks[6:10], cexp),
    }
    if downsample:
        params["ws"] = 0.1 * jax.random.normal(ks[10], (cexp, in_channel, 1, 1),
                                               jnp.float32)
        params["bns"] = bn(ks[11:15], cexp)
    return params


if __name__ == "__main__":
    key = jax.random.PRNGKey(0)
    k_p1, k_x1, k_p2, k_x2 = jax.random.split(key, 4)

    configs = [
        # (in_ch, out_ch, expansion, stride, downsample, N, H, W)
        (4, 8, 1, 2, True, 2, 16, 16),    # projection (downsample) block
        (8, 8, 1, 1, False, 2, 16, 16),   # identity block
    ]
    for (cin, cout, exp, stride, ds, N, H, W), kp, kx in zip(
            configs, (k_p1, k_p2), (k_x1, k_x2)):
        params = _make_params(kp, cin, cout, exp, ds)
        x = jax.random.normal(kx, (N, cin, H, W), jnp.float32)

        fwd = jax.jit(functools.partial(basic_block_forward, stride=stride,
                                        downsample=ds))
        out = jax.block_until_ready(fwd(x, params))

        ref = basic_block_ref(x, params, stride, ds)
        assert out.shape == ref.shape == (N, cout * exp, H // stride,
                                          W // stride)
        err = jnp.max(jnp.abs(out - ref))
        # bf16 MXU inputs + bf16 intermediate activation, f32 accumulation.
        assert jnp.allclose(out, ref, atol=3e-2, rtol=3e-2), f"max err {err}"

    print("KERNEL_OK")
</pallas_src>

<mosaic_0001>
module attributes {stable_mosaic.version = 11 : i64} {
  func.func @_conv_bn_relu_kernel(%arg0: i32, %arg1: i32, %arg2: memref<4x9x9x4xbf16, #tpu.memory_space<vmem>>, %arg3: memref<9x4x128xbf16, #tpu.memory_space<vmem>>, %arg4: memref<1x128xf32, #tpu.memory_space<vmem>>, %arg5: memref<1x8x8x128xbf16, #tpu.memory_space<vmem>>) attributes {dimension_semantics = [#tpu.dimension_semantics<parallel>, #tpu.dimension_semantics<parallel>], iteration_bounds = array<i64: 2, 1>, scalar_prefetch = 0 : i64, scratch_operands = 0 : i64, tpu.core_type = #tpu.core_type<tc>, window_params = [{transform_indices = @transform_0, window_bounds = array<i64: 4, 9, 9, 4>}, {transform_indices = @transform_1, window_bounds = array<i64: 9, 4, 128>}, {transform_indices = @transform_2, window_bounds = array<i64: 1, 128>}, {transform_indices = @transform_3, window_bounds = array<i64: 1, 8, 8, 128>}]} {
    %cst = arith.constant 0.000000e+00 : f32
    %0 = vector.broadcast %cst : f32 to vector<64x128xf32>
    %c0 = arith.constant 0 : index
    %c0_0 = arith.constant 0 : index
    %c0_1 = arith.constant 0 : index
    %c0_2 = arith.constant 0 : index
    %1 = vector.load %arg2[%c0, %c0_0, %c0_1, %c0_2] : memref<4x9x9x4xbf16, #tpu.memory_space<vmem>>, vector<1x8x8x4xbf16>
    %2 = vector.shape_cast %1 : vector<1x8x8x4xbf16> to vector<8x8x4xbf16>
    %3 = vector.shape_cast %2 : vector<8x8x4xbf16> to vector<64x4xbf16>
    %c0_3 = arith.constant 0 : index
    %c0_4 = arith.constant 0 : index
    %c0_5 = arith.constant 0 : index
    %4 = vector.load %arg3[%c0_3, %c0_4, %c0_5] : memref<9x4x128xbf16, #tpu.memory_space<vmem>>, vector<1x4x128xbf16>
    %5 = vector.shape_cast %4 : vector<1x4x128xbf16> to vector<4x128xbf16>
    %cst_6 = arith.constant dense<0.000000e+00> : vector<64x128xf32>
    %6 = tpu.matmul %3, %5, %cst_6 {dimension_numbers = #tpu.dot_dimension_numbers<[1], [0], [0], [1], [0, 0, 1, 1], [], []>} : vector<64x4xbf16>, vector<4x128xbf16>, vector<64x128xf32> -> vector<64x128xf32>
    %7 = arith.addf %0, %6 : vector<64x128xf32>
    %c1 = arith.constant 1 : index
    %c0_7 = arith.constant 0 : index
    %c0_8 = arith.constant 0 : index
    %c0_9 = arith.constant 0 : index
    %8 = vector.load %arg2[%c1, %c0_7, %c0_8, %c0_9] : memref<4x9x9x4xbf16, #tpu.memory_space<vmem>>, vector<1x8x8x4xbf16>
    %9 = vector.shape_cast %8 : vector<1x8x8x4xbf16> to vector<8x8x4xbf16>
    %10 = vector.shape_cast %9 : vector<8x8x4xbf16> to vector<64x4xbf16>
    %c1_10 = arith.constant 1 : index
    %c0_11 = arith.constant 0 : index
    %c0_12 = arith.constant 0 : index
    %11 = vector.load %arg3[%c1_10, %c0_11, %c0_12] : memref<9x4x128xbf16, #tpu.memory_space<vmem>>, vector<1x4x128xbf16>
    %12 = vector.shape_cast %11 : vector<1x4x128xbf16> to vector<4x128xbf16>
    %cst_13 = arith.constant dense<0.000000e+00> : vector<64x128xf32>
    %13 = tpu.matmul %10, %12, %cst_13 {dimension_numbers = #tpu.dot_dimension_numbers<[1], [0], [0], [1], [0, 0, 1, 1], [], []>} : vector<64x4xbf16>, vector<4x128xbf16>, vector<64x128xf32> -> vector<64x128xf32>
    %14 = arith.addf %7, %13 : vector<64x128xf32>
    %c0_14 = arith.constant 0 : index
    %c0_15 = arith.constant 0 : index
    %c1_16 = arith.constant 1 : index
    %c0_17 = arith.constant 0 : index
    %15 = vector.load %arg2[%c0_14, %c0_15, %c1_16, %c0_17] : memref<4x9x9x4xbf16, #tpu.memory_space<vmem>>, vector<1x8x8x4xbf16>
    %16 = vector.shape_cast %15 : vector<1x8x8x4xbf16> to vector<8x8x4xbf16>
    %17 = vector.shape_cast %16 : vector<8x8x4xbf16> to vector<64x4xbf16>
    %c2 = arith.constant 2 : index
    %c0_18 = arith.constant 0 : index
    %c0_19 = arith.constant 0 : index
    %18 = vector.load %arg3[%c2, %c0_18, %c0_19] : memref<9x4x128xbf16, #tpu.memory_space<vmem>>, vector<1x4x128xbf16>
    %19 = vector.shape_cast %18 : vector<1x4x128xbf16> to vector<4x128xbf16>
    %cst_20 = arith.constant dense<0.000000e+00> : vector<64x128xf32>
    %20 = tpu.matmul %17, %19, %cst_20 {dimension_numbers = #tpu.dot_dimension_numbers<[1], [0], [0], [1], [0, 0, 1, 1], [], []>} : vector<64x4xbf16>, vector<4x128xbf16>, vector<64x128xf32> -> vector<64x128xf32>
    %21 = arith.addf %14, %20 : vector<64x128xf32>
    %c2_21 = arith.constant 2 : index
    %c0_22 = arith.constant 0 : index
    %c0_23 = arith.constant 0 : index
    %c0_24 = arith.constant 0 : index
    %22 = vector.load %arg2[%c2_21, %c0_22, %c0_23, %c0_24] : memref<4x9x9x4xbf16, #tpu.memory_space<vmem>>, vector<1x8x8x4xbf16>
    %23 = vector.shape_cast %22 : vector<1x8x8x4xbf16> to vector<8x8x4xbf16>
    %24 = vector.shape_cast %23 : vector<8x8x4xbf16> to vector<64x4xbf16>
    %c3 = arith.constant 3 : index
    %c0_25 = arith.constant 0 : index
    %c0_26 = arith.constant 0 : index
    %25 = vector.load %arg3[%c3, %c0_25, %c0_26] : memref<9x4x128xbf16, #tpu.memory_space<vmem>>, vector<1x4x128xbf16>
    %26 = vector.shape_cast %25 : vector<1x4x128xbf16> to vector<4x128xbf16>
    %cst_27 = arith.constant dense<0.000000e+00> : vector<64x128xf32>
    %27 = tpu.matmul %24, %26, %cst_27 {dimension_numbers = #tpu.dot_dimension_numbers<[1], [0], [0], [1], [0, 0, 1, 1], [], []>} : vector<64x4xbf16>, vector<4x128xbf16>, vector<64x128xf32> -> vector<64x128xf32>
    %28 = arith.addf %21, %27 : vector<64x128xf32>
    %c3_28 = arith.constant 3 : index
    %c0_29 = arith.constant 0 : index
    %c0_30 = arith.constant 0 : index
    %c0_31 = arith.constant 0 : index
    %29 = vector.load %arg2[%c3_28, %c0_29, %c0_30, %c0_31] : memref<4x9x9x4xbf16, #tpu.memory_space<vmem>>, vector<1x8x8x4xbf16>
    %30 = vector.shape_cast %29 : vector<1x8x8x4xbf16> to vector<8x8x4xbf16>
    %31 = vector.shape_cast %30 : vector<8x8x4xbf16> to vector<64x4xbf16>
    %c4 = arith.constant 4 : index
    %c0_32 = arith.constant 0 : index
    %c0_33 = arith.constant 0 : index
    %32 = vector.load %arg3[%c4, %c0_32, %c0_33] : memref<9x4x128xbf16, #tpu.memory_space<vmem>>, vector<1x4x128xbf16>
    %33 = vector.shape_cast %32 : vector<1x4x128xbf16> to vector<4x128xbf16>
    %cst_34 = arith.constant dense<0.000000e+00> : vector<64x128xf32>
    %34 = tpu.matmul %31, %33, %cst_34 {dimension_numbers = #tpu.dot_dimension_numbers<[1], [0], [0], [1], [0, 0, 1, 1], [], []>} : vector<64x4xbf16>, vector<4x128xbf16>, vector<64x128xf32> -> vector<64x128xf32>
    %35 = arith.addf %28, %34 : vector<64x128xf32>
    %c2_35 = arith.constant 2 : index
    %c0_36 = arith.constant 0 : index
    %c1_37 = arith.constant 1 : index
    %c0_38 = arith.constant 0 : index
    %36 = vector.load %arg2[%c2_35, %c0_36, %c1_37, %c0_38] : memref<4x9x9x4xbf16, #tpu.memory_space<vmem>>, vector<1x8x8x4xbf16>
    %37 = vector.shape_cast %36 : vector<1x8x8x4xbf16> to vector<8x8x4xbf16>
    %38 = vector.shape_cast %37 : vector<8x8x4xbf16> to vector<64x4xbf16>
    %c5 = arith.constant 5 : index
    %c0_39 = arith.constant 0 : index
    %c0_40 = arith.constant 0 : index
    %39 = vector.load %arg3[%c5, %c0_39, %c0_40] : memref<9x4x128xbf16, #tpu.memory_space<vmem>>, vector<1x4x128xbf16>
    %40 = vector.shape_cast %39 : vector<1x4x128xbf16> to vector<4x128xbf16>
    %cst_41 = arith.constant dense<0.000000e+00> : vector<64x128xf32>
    %41 = tpu.matmul %38, %40, %cst_41 {dimension_numbers = #tpu.dot_dimension_numbers<[1], [0], [0], [1], [0, 0, 1, 1], [], []>} : vector<64x4xbf16>, vector<4x128xbf16>, vector<64x128xf32> -> vector<64x128xf32>
    %42 = arith.addf %35, %41 : vector<64x128xf32>
    %c0_42 = arith.constant 0 : index
    %c1_43 = arith.constant 1 : index
    %c0_44 = arith.constant 0 : index
    %c0_45 = arith.constant 0 : index
    %43 = vector.load %arg2[%c0_42, %c1_43, %c0_44, %c0_45] : memref<4x9x9x4xbf16, #tpu.memory_space<vmem>>, vector<1x8x8x4xbf16>
    %44 = vector.shape_cast %43 : vector<1x8x8x4xbf16> to vector<8x8x4xbf16>
    %45 = vector.shape_cast %44 : vector<8x8x4xbf16> to vector<64x4xbf16>
    %c6 = arith.constant 6 : index
    %c0_46 = arith.constant 0 : index
    %c0_47 = arith.constant 0 : index
    %46 = vector.load %arg3[%c6, %c0_46, %c0_47] : memref<9x4x128xbf16, #tpu.memory_space<vmem>>, vector<1x4x128xbf16>
    %47 = vector.shape_cast %46 : vector<1x4x128xbf16> to vector<4x128xbf16>
    %cst_48 = arith.constant dense<0.000000e+00> : vector<64x128xf32>
    %48 = tpu.matmul %45, %47, %cst_48 {dimension_numbers = #tpu.dot_dimension_numbers<[1], [0], [0], [1], [0, 0, 1, 1], [], []>} : vector<64x4xbf16>, vector<4x128xbf16>, vector<64x128xf32> -> vector<64x128xf32>
    %49 = arith.addf %42, %48 : vector<64x128xf32>
    %c1_49 = arith.constant 1 : index
    %c1_50 = arith.constant 1 : index
    %c0_51 = arith.constant 0 : index
    %c0_52 = arith.constant 0 : index
    %50 = vector.load %arg2[%c1_49, %c1_50, %c0_51, %c0_52] : memref<4x9x9x4xbf16, #tpu.memory_space<vmem>>, vector<1x8x8x4xbf16>
    %51 = vector.shape_cast %50 : vector<1x8x8x4xbf16> to vector<8x8x4xbf16>
    %52 = vector.shape_cast %51 : vector<8x8x4xbf16> to vector<64x4xbf16>
    %c7 = arith.constant 7 : index
    %c0_53 = arith.constant 0 : index
    %c0_54 = arith.constant 0 : index
    %53 = vector.load %arg3[%c7, %c0_53, %c0_54] : memref<9x4x128xbf16, #tpu.memory_space<vmem>>, vector<1x4x128xbf16>
    %54 = vector.shape_cast %53 : vector<1x4x128xbf16> to vector<4x128xbf16>
    %cst_55 = arith.constant dense<0.000000e+00> : vector<64x128xf32>
    %55 = tpu.matmul %52, %54, %cst_55 {dimension_numbers = #tpu.dot_dimension_numbers<[1], [0], [0], [1], [0, 0, 1, 1], [], []>} : vector<64x4xbf16>, vector<4x128xbf16>, vector<64x128xf32> -> vector<64x128xf32>
    %56 = arith.addf %49, %55 : vector<64x128xf32>
    %c0_56 = arith.constant 0 : index
    %c1_57 = arith.constant 1 : index
    %c1_58 = arith.constant 1 : index
    %c0_59 = arith.constant 0 : index
    %57 = vector.load %arg2[%c0_56, %c1_57, %c1_58, %c0_59] : memref<4x9x9x4xbf16, #tpu.memory_space<vmem>>, vector<1x8x8x4xbf16>
    %58 = vector.shape_cast %57 : vector<1x8x8x4xbf16> to vector<8x8x4xbf16>
    %59 = vector.shape_cast %58 : vector<8x8x4xbf16> to vector<64x4xbf16>
    %c8 = arith.constant 8 : index
    %c0_60 = arith.constant 0 : index
    %c0_61 = arith.constant 0 : index
    %60 = vector.load %arg3[%c8, %c0_60, %c0_61] : memref<9x4x128xbf16, #tpu.memory_space<vmem>>, vector<1x4x128xbf16>
    %61 = vector.shape_cast %60 : vector<1x4x128xbf16> to vector<4x128xbf16>
    %cst_62 = arith.constant dense<0.000000e+00> : vector<64x128xf32>
    %62 = tpu.matmul %59, %61, %cst_62 {dimension_numbers = #tpu.dot_dimension_numbers<[1], [0], [0], [1], [0, 0, 1, 1], [], []>} : vector<64x4xbf16>, vector<4x128xbf16>, vector<64x128xf32> -> vector<64x128xf32>
    %63 = arith.addf %56, %62 : vector<64x128xf32>
    %c0_63 = arith.constant 0 : index
    %c0_64 = arith.constant 0 : index
    %64 = vector.load %arg4[%c0_63, %c0_64] : memref<1x128xf32, #tpu.memory_space<vmem>>, vector<1x128xf32>
    %65 = vector.broadcast %64 : vector<1x128xf32> to vector<64x128xf32>
    %66 = arith.addf %63, %65 : vector<64x128xf32>
    %cst_65 = arith.constant 0.000000e+00 : f32
    %67 = vector.broadcast %cst_65 : f32 to vector<64x128xf32>
    %68 = arith.maximumf %66, %67 : vector<64x128xf32>
    %69 = vector.shape_cast %68 : vector<64x128xf32> to vector<1x8x8x128xf32>
    %70 = arith.truncf %69 : vector<1x8x8x128xf32> to vector<1x8x8x128xbf16>
    %c0_66 = arith.constant 0 : index
    %c0_67 = arith.constant 0 : index
    %c0_68 = arith.constant 0 : index
    %c0_69 = arith.constant 0 : index
    %71 = vector.load %arg5[%c0_66, %c0_67, %c0_68, %c0_69] : memref<1x8x8x128xbf16, #tpu.memory_space<vmem>>, vector<1x8x8x128xbf16>
    tpu.vector_store %arg5[%c0_66, %c0_67, %c0_68, %c0_69], %70 {strides = array<i32>} : memref<1x8x8x128xbf16, #tpu.memory_space<vmem>>, vector<1x8x8x128xbf16>,
    return
  }
  func.func @transform_0(%arg0: i32, %arg1: i32) -> (i32, i32, i32, i32) {
    %c0_i32 = arith.constant 0 : i32
    %c0_i32_0 = arith.constant 0 : i32
    %c0_i32_1 = arith.constant 0 : i32
    %c0_i32_2 = arith.constant 0 : i32
    return %arg0, %c0_i32, %c0_i32_0, %c0_i32_1 : i32, i32, i32, i32
  }
  func.func @transform_1(%arg0: i32, %arg1: i32) -> (i32, i32, i32) {
    %c0_i32 = arith.constant 0 : i32
    %c0_i32_0 = arith.constant 0 : i32
    %c0_i32_1 = arith.constant 0 : i32
    return %c0_i32, %c0_i32_0, %arg1 : i32, i32, i32
  }
  func.func @transform_2(%arg0: i32, %arg1: i32) -> (i32, i32) {
    %c0_i32 = arith.constant 0 : i32
    %c0_i32_0 = arith.constant 0 : i32
    return %c0_i32, %arg1 : i32, i32
  }
  func.func @transform_3(%arg0: i32, %arg1: i32) -> (i32, i32, i32, i32) {
    %c0_i32 = arith.constant 0 : i32
    %c0_i32_0 = arith.constant 0 : i32
    %c0_i32_1 = arith.constant 0 : i32
    return %arg0, %c0_i32, %c0_i32_0, %arg1 : i32, i32, i32, i32
  }
}

module attributes {stable_mosaic.version = 11 : i64} {
  func.func @_conv_bn_proj_relu_kernel(%arg0: i32, %arg1: i32, %arg2: memref<1x10x10x128xbf16, #tpu.memory_space<vmem>>, %arg3: memref<9x128x128xbf16, #tpu.memory_space<vmem>>, %arg4: memref<1x128xf32, #tpu.memory_space<vmem>>, %arg5: memref<1x8x8x4xbf16, #tpu.memory_space<vmem>>, %arg6: memref<4x128xbf16, #tpu.memory_space<vmem>>, %arg7: memref<1x128xf32, #tpu.memory_space<vmem>>, %arg8: memref<1x8x8x128xf32, #tpu.memory_space<vmem>>) attributes {dimension_semantics = [#tpu.dimension_semantics<parallel>, #tpu.dimension_semantics<parallel>], iteration_bounds = array<i64: 2, 1>, scalar_prefetch = 0 : i64, scratch_operands = 0 : i64, tpu.core_type = #tpu.core_type<tc>, window_params = [{transform_indices = @transform_0, window_bounds = array<i64: 1, 10, 10, 128>}, {transform_indices = @transform_1, window_bounds = array<i64: 9, 128, 128>}, {transform_indices = @transform_2, window_bounds = array<i64: 1, 128>}, {transform_indices = @transform_3, window_bounds = array<i64: 1, 8, 8, 4>}, {transform_indices = @transform_4, window_bounds = array<i64: 4, 128>}, {transform_indices = @transform_5, window_bounds = array<i64: 1, 128>}, {transform_indices = @transform_6, window_bounds = array<i64: 1, 8, 8, 128>}]} {
    %cst = arith.constant 0.000000e+00 : f32
    %0 = vector.broadcast %cst : f32 to vector<64x128xf32>
    %c0 = arith.constant 0 : index
    %c0_0 = arith.constant 0 : index
    %c0_1 = arith.constant 0 : index
    %c0_2 = arith.constant 0 : index
    %1 = vector.load %arg2[%c0, %c0_0, %c0_1, %c0_2] : memref<1x10x10x128xbf16, #tpu.memory_space<vmem>>, vector<1x8x8x128xbf16>
    %2 = vector.shape_cast %1 : vector<1x8x8x128xbf16> to vector<8x8x128xbf16>
    %3 = vector.shape_cast %2 : vector<8x8x128xbf16> to vector<64x128xbf16>
    %c0_3 = arith.constant 0 : index
    %c0_4 = arith.constant 0 : index
    %c0_5 = arith.constant 0 : index
    %4 = vector.load %arg3[%c0_3, %c0_4, %c0_5] : memref<9x128x128xbf16, #tpu.memory_space<vmem>>, vector<1x128x128xbf16>
    %5 = vector.shape_cast %4 : vector<1x128x128xbf16> to vector<128x128xbf16>
    %cst_6 = arith.constant dense<0.000000e+00> : vector<64x128xf32>
    %6 = tpu.matmul %3, %5, %cst_6 {dimension_numbers = #tpu.dot_dimension_numbers<[1], [0], [0], [1], [0, 0, 1, 1], [], []>} : vector<64x128xbf16>, vector<128x128xbf16>, vector<64x128xf32> -> vector<64x128xf32>
    %7 = arith.addf %0, %6 : vector<64x128xf32>
    %c0_7 = arith.constant 0 : index
    %c0_8 = arith.constant 0 : index
    %c1 = arith.constant 1 : index
    %c0_9 = arith.constant 0 : index
    %8 = vector.load %arg2[%c0_7, %c0_8, %c1, %c0_9] : memref<1x10x10x128xbf16, #tpu.memory_space<vmem>>, vector<1x8x8x128xbf16>
    %9 = vector.shape_cast %8 : vector<1x8x8x128xbf16> to vector<8x8x128xbf16>
    %10 = vector.shape_cast %9 : vector<8x8x128xbf16> to vector<64x128xbf16>
    %c1_10 = arith.constant 1 : index
    %c0_11 = arith.constant 0 : index
    %c0_12 = arith.constant 0 : index
    %11 = vector.load %arg3[%c1_10, %c0_11, %c0_12] : memref<9x128x128xbf16, #tpu.memory_space<vmem>>, vector<1x128x128xbf16>
    %12 = vector.shape_cast %11 : vector<1x128x128xbf16> to vector<128x128xbf16>
    %cst_13 = arith.constant dense<0.000000e+00> : vector<64x128xf32>
    %13 = tpu.matmul %10, %12, %cst_13 {dimension_numbers = #tpu.dot_dimension_numbers<[1], [0], [0], [1], [0, 0, 1, 1], [], []>} : vector<64x128xbf16>, vector<128x128xbf16>, vector<64x128xf32> -> vector<64x128xf32>
    %14 = arith.addf %7, %13 : vector<64x128xf32>
    %c0_14 = arith.constant 0 : index
    %c0_15 = arith.constant 0 : index
    %c2 = arith.constant 2 : index
    %c0_16 = arith.constant 0 : index
    %15 = vector.load %arg2[%c0_14, %c0_15, %c2, %c0_16] : memref<1x10x10x128xbf16, #tpu.memory_space<vmem>>, vector<1x8x8x128xbf16>
    %16 = vector.shape_cast %15 : vector<1x8x8x128xbf16> to vector<8x8x128xbf16>
    %17 = vector.shape_cast %16 : vector<8x8x128xbf16> to vector<64x128xbf16>
    %c2_17 = arith.constant 2 : index
    %c0_18 = arith.constant 0 : index
    %c0_19 = arith.constant 0 : index
    %18 = vector.load %arg3[%c2_17, %c0_18, %c0_19] : memref<9x128x128xbf16, #tpu.memory_space<vmem>>, vector<1x128x128xbf16>
    %19 = vector.shape_cast %18 : vector<1x128x128xbf16> to vector<128x128xbf16>
    %cst_20 = arith.constant dense<0.000000e+00> : vector<64x128xf32>
    %20 = tpu.matmul %17, %19, %cst_20 {dimension_numbers = #tpu.dot_dimension_numbers<[1], [0], [0], [1], [0, 0, 1, 1], [], []>} : vector<64x128xbf16>, vector<128x128xbf16>, vector<64x128xf32> -> vector<64x128xf32>
    %21 = arith.addf %14, %20 : vector<64x128xf32>
    %c0_21 = arith.constant 0 : index
    %c1_22 = arith.constant 1 : index
    %c0_23 = arith.constant 0 : index
    %c0_24 = arith.constant 0 : index
    %22 = vector.load %arg2[%c0_21, %c1_22, %c0_23, %c0_24] : memref<1x10x10x128xbf16, #tpu.memory_space<vmem>>, vector<1x8x8x128xbf16>
    %23 = vector.shape_cast %22 : vector<1x8x8x128xbf16> to vector<8x8x128xbf16>
    %24 = vector.shape_cast %23 : vector<8x8x128xbf16> to vector<64x128xbf16>
    %c3 = arith.constant 3 : index
    %c0_25 = arith.constant 0 : index
    %c0_26 = arith.constant 0 : index
    %25 = vector.load %arg3[%c3, %c0_25, %c0_26] : memref<9x128x128xbf16, #tpu.memory_space<vmem>>, vector<1x128x128xbf16>
    %26 = vector.shape_cast %25 : vector<1x128x128xbf16> to vector<128x128xbf16>
    %cst_27 = arith.constant dense<0.000000e+00> : vector<64x128xf32>
    %27 = tpu.matmul %24, %26, %cst_27 {dimension_numbers = #tpu.dot_dimension_numbers<[1], [0], [0], [1], [0, 0, 1, 1], [], []>} : vector<64x128xbf16>, vector<128x128xbf16>, vector<64x128xf32> -> vector<64x128xf32>
    %28 = arith.addf %21, %27 : vector<64x128xf32>
    %c0_28 = arith.constant 0 : index
    %c1_29 = arith.constant 1 : index
    %c1_30 = arith.constant 1 : index
    %c0_31 = arith.constant 0 : index
    %29 = vector.load %arg2[%c0_28, %c1_29, %c1_30, %c0_31] : memref<1x10x10x128xbf16, #tpu.memory_space<vmem>>, vector<1x8x8x128xbf16>
    %30 = vector.shape_cast %29 : vector<1x8x8x128xbf16> to vector<8x8x128xbf16>
    %31 = vector.shape_cast %30 : vector<8x8x128xbf16> to vector<64x128xbf16>
    %c4 = arith.constant 4 : index
    %c0_32 = arith.constant 0 : index
    %c0_33 = arith.constant 0 : index
    %32 = vector.load %arg3[%c4, %c0_32, %c0_33] : memref<9x128x128xbf16, #tpu.memory_space<vmem>>, vector<1x128x128xbf16>
    %33 = vector.shape_cast %32 : vector<1x128x128xbf16> to vector<128x128xbf16>
    %cst_34 = arith.constant dense<0.000000e+00> : vector<64x128xf32>
    %34 = tpu.matmul %31, %33, %cst_34 {dimension_numbers = #tpu.dot_dimension_numbers<[1], [0], [0], [1], [0, 0, 1, 1], [], []>} : vector<64x128xbf16>, vector<128x128xbf16>, vector<64x128xf32> -> vector<64x128xf32>
    %35 = arith.addf %28, %34 : vector<64x128xf32>
    %c0_35 = arith.constant 0 : index
    %c1_36 = arith.constant 1 : index
    %c2_37 = arith.constant 2 : index
    %c0_38 = arith.constant 0 : index
    %36 = vector.load %arg2[%c0_35, %c1_36, %c2_37, %c0_38] : memref<1x10x10x128xbf16, #tpu.memory_space<vmem>>, vector<1x8x8x128xbf16>
    %37 = vector.shape_cast %36 : vector<1x8x8x128xbf16> to vector<8x8x128xbf16>
    %38 = vector.shape_cast %37 : vector<8x8x128xbf16> to vector<64x128xbf16>
    %c5 = arith.constant 5 : index
    %c0_39 = arith.constant 0 : index
    %c0_40 = arith.constant 0 : index
    %39 = vector.load %arg3[%c5, %c0_39, %c0_40] : memref<9x128x128xbf16, #tpu.memory_space<vmem>>, vector<1x128x128xbf16>
    %40 = vector.shape_cast %39 : vector<1x128x128xbf16> to vector<128x128xbf16>
    %cst_41 = arith.constant dense<0.000000e+00> : vector<64x128xf32>
    %41 = tpu.matmul %38, %40, %cst_41 {dimension_numbers = #tpu.dot_dimension_numbers<[1], [0], [0], [1], [0, 0, 1, 1], [], []>} : vector<64x128xbf16>, vector<128x128xbf16>, vector<64x128xf32> -> vector<64x128xf32>
    %42 = arith.addf %35, %41 : vector<64x128xf32>
    %c0_42 = arith.constant 0 : index
    %c2_43 = arith.constant 2 : index
    %c0_44 = arith.constant 0 : index
    %c0_45 = arith.constant 0 : index
    %43 = vector.load %arg2[%c0_42, %c2_43, %c0_44, %c0_45] : memref<1x10x10x128xbf16, #tpu.memory_space<vmem>>, vector<1x8x8x128xbf16>
    %44 = vector.shape_cast %43 : vector<1x8x8x128xbf16> to vector<8x8x128xbf16>
    %45 = vector.shape_cast %44 : vector<8x8x128xbf16> to vector<64x128xbf16>
    %c6 = arith.constant 6 : index
    %c0_46 = arith.constant 0 : index
    %c0_47 = arith.constant 0 : index
    %46 = vector.load %arg3[%c6, %c0_46, %c0_47] : memref<9x128x128xbf16, #tpu.memory_space<vmem>>, vector<1x128x128xbf16>
    %47 = vector.shape_cast %46 : vector<1x128x128xbf16> to vector<128x128xbf16>
    %cst_48 = arith.constant dense<0.000000e+00> : vector<64x128xf32>
    %48 = tpu.matmul %45, %47, %cst_48 {dimension_numbers = #tpu.dot_dimension_numbers<[1], [0], [0], [1], [0, 0, 1, 1], [], []>} : vector<64x128xbf16>, vector<128x128xbf16>, vector<64x128xf32> -> vector<64x128xf32>
    %49 = arith.addf %42, %48 : vector<64x128xf32>
    %c0_49 = arith.constant 0 : index
    %c2_50 = arith.constant 2 : index
    %c1_51 = arith.constant 1 : index
    %c0_52 = arith.constant 0 : index
    %50 = vector.load %arg2[%c0_49, %c2_50, %c1_51, %c0_52] : memref<1x10x10x128xbf16, #tpu.memory_space<vmem>>, vector<1x8x8x128xbf16>
    %51 = vector.shape_cast %50 : vector<1x8x8x128xbf16> to vector<8x8x128xbf16>
    %52 = vector.shape_cast %51 : vector<8x8x128xbf16> to vector<64x128xbf16>
    %c7 = arith.constant 7 : index
    %c0_53 = arith.constant 0 : index
    %c0_54 = arith.constant 0 : index
    %53 = vector.load %arg3[%c7, %c0_53, %c0_54] : memref<9x128x128xbf16, #tpu.memory_space<vmem>>, vector<1x128x128xbf16>
    %54 = vector.shape_cast %53 : vector<1x128x128xbf16> to vector<128x128xbf16>
    %cst_55 = arith.constant dense<0.000000e+00> : vector<64x128xf32>
    %55 = tpu.matmul %52, %54, %cst_55 {dimension_numbers = #tpu.dot_dimension_numbers<[1], [0], [0], [1], [0, 0, 1, 1], [], []>} : vector<64x128xbf16>, vector<128x128xbf16>, vector<64x128xf32> -> vector<64x128xf32>
    %56 = arith.addf %49, %55 : vector<64x128xf32>
    %c0_56 = arith.constant 0 : index
    %c2_57 = arith.constant 2 : index
    %c2_58 = arith.constant 2 : index
    %c0_59 = arith.constant 0 : index
    %57 = vector.load %arg2[%c0_56, %c2_57, %c2_58, %c0_59] : memref<1x10x10x128xbf16, #tpu.memory_space<vmem>>, vector<1x8x8x128xbf16>
    %58 = vector.shape_cast %57 : vector<1x8x8x128xbf16> to vector<8x8x128xbf16>
    %59 = vector.shape_cast %58 : vector<8x8x128xbf16> to vector<64x128xbf16>
    %c8 = arith.constant 8 : index
    %c0_60 = arith.constant 0 : index
    %c0_61 = arith.constant 0 : index
    %60 = vector.load %arg3[%c8, %c0_60, %c0_61] : memref<9x128x128xbf16, #tpu.memory_space<vmem>>, vector<1x128x128xbf16>
    %61 = vector.shape_cast %60 : vector<1x128x128xbf16> to vector<128x128xbf16>
    %cst_62 = arith.constant dense<0.000000e+00> : vector<64x128xf32>
    %62 = tpu.matmul %59, %61, %cst_62 {dimension_numbers = #tpu.dot_dimension_numbers<[1], [0], [0], [1], [0, 0, 1, 1], [], []>} : vector<64x128xbf16>, vector<128x128xbf16>, vector<64x128xf32> -> vector<64x128xf32>
    %63 = arith.addf %56, %62 : vector<64x128xf32>
    %c0_63 = arith.constant 0 : index
    %c0_64 = arith.constant 0 : index
    %c0_65 = arith.constant 0 : index
    %c0_66 = arith.constant 0 : index
    %64 = vector.load %arg5[%c0_63, %c0_64, %c0_65, %c0_66] : memref<1x8x8x4xbf16, #tpu.memory_space<vmem>>, vector<1x8x8x4xbf16>
    %65 = vector.shape_cast %64 : vector<1x8x8x4xbf16> to vector<8x8x4xbf16>
    %66 = vector.shape_cast %65 : vector<8x8x4xbf16> to vector<64x4xbf16>
    %c0_67 = arith.constant 0 : index
    %c0_68 = arith.constant 0 : index
    %67 = vector.load %arg6[%c0_67, %c0_68] : memref<4x128xbf16, #tpu.memory_space<vmem>>, vector<4x128xbf16>
    %cst_69 = arith.constant dense<0.000000e+00> : vector<64x128xf32>
    %68 = tpu.matmul %66, %67, %cst_69 {dimension_numbers = #tpu.dot_dimension_numbers<[1], [0], [0], [1], [0, 0, 1, 1], [], []>} : vector<64x4xbf16>, vector<4x128xbf16>, vector<64x128xf32> -> vector<64x128xf32>
    %69 = arith.addf %63, %68 : vector<64x128xf32>
    %c0_70 = arith.constant 0 : index
    %c0_71 = arith.constant 0 : index
    %70 = vector.load %arg4[%c0_70, %c0_71] : memref<1x128xf32, #tpu.memory_space<vmem>>, vector<1x128xf32>
    %71 = vector.broadcast %70 : vector<1x128xf32> to vector<64x128xf32>
    %72 = arith.addf %69, %71 : vector<64x128xf32>
    %c0_72 = arith.constant 0 : index
    %c0_73 = arith.constant 0 : index
    %73 = vector.load %arg7[%c0_72, %c0_73] : memref<1x128xf32, #tpu.memory_space<vmem>>, vector<1x128xf32>
    %74 = vector.broadcast %73 : vector<1x128xf32> to vector<64x128xf32>
    %75 = arith.addf %72, %74 : vector<64x128xf32>
    %cst_74 = arith.constant 0.000000e+00 : f32
    %76 = vector.broadcast %cst_74 : f32 to vector<64x128xf32>
    %77 = arith.maximumf %75, %76 : vector<64x128xf32>
    %78 = vector.shape_cast %77 : vector<64x128xf32> to vector<1x8x8x128xf32>
    %c0_75 = arith.constant 0 : index
    %c0_76 = arith.constant 0 : index
    %c0_77 = arith.constant 0 : index
    %c0_78 = arith.constant 0 : index
    %79 = vector.load %arg8[%c0_75, %c0_76, %c0_77, %c0_78] : memref<1x8x8x128xf32, #tpu.memory_space<vmem>>, vector<1x8x8x128xf32>
    tpu.vector_store %arg8[%c0_75, %c0_76, %c0_77, %c0_78], %78 {strides = array<i32>} : memref<1x8x8x128xf32, #tpu.memory_space<vmem>>, vector<1x8x8x128xf32>,
    return
  }
  func.func @transform_0(%arg0: i32, %arg1: i32) -> (i32, i32, i32, i32) {
    %c0_i32 = arith.constant 0 : i32
    %c0_i32_0 = arith.constant 0 : i32
    %c0_i32_1 = arith.constant 0 : i32
    %c0_i32_2 = arith.constant 0 : i32
    return %arg0, %c0_i32, %c0_i32_0, %c0_i32_1 : i32, i32, i32, i32
  }
  func.func @transform_1(%arg0: i32, %arg1: i32) -> (i32, i32, i32) {
    %c0_i32 = arith.constant 0 : i32
    %c0_i32_0 = arith.constant 0 : i32
    %c0_i32_1 = arith.constant 0 : i32
    return %c0_i32, %c0_i32_0, %arg1 : i32, i32, i32
  }
  func.func @transform_2(%arg0: i32, %arg1: i32) -> (i32, i32) {
    %c0_i32 = arith.constant 0 : i32
    %c0_i32_0 = arith.constant 0 : i32
    return %c0_i32, %arg1 : i32, i32
  }
  func.func @transform_3(%arg0: i32, %arg1: i32) -> (i32, i32, i32, i32) {
    %c0_i32 = arith.constant 0 : i32
    %c0_i32_0 = arith.constant 0 : i32
    %c0_i32_1 = arith.constant 0 : i32
    %c0_i32_2 = arith.constant 0 : i32
    return %arg0, %c0_i32, %c0_i32_0, %c0_i32_1 : i32, i32, i32, i32
  }
  func.func @transform_4(%arg0: i32, %arg1: i32) -> (i32, i32) {
    %c0_i32 = arith.constant 0 : i32
    %c0_i32_0 = arith.constant 0 : i32
    return %c0_i32, %arg1 : i32, i32
  }
  func.func @transform_5(%arg0: i32, %arg1: i32) -> (i32, i32) {
    %c0_i32 = arith.constant 0 : i32
    %c0_i32_0 = arith.constant 0 : i32
    return %c0_i32, %arg1 : i32, i32
  }
  func.func @transform_6(%arg0: i32, %arg1: i32) -> (i32, i32, i32, i32) {
    %c0_i32 = arith.constant 0 : i32
    %c0_i32_0 = arith.constant 0 : i32
    %c0_i32_1 = arith.constant 0 : i32
    return %arg0, %c0_i32, %c0_i32_0, %arg1 : i32, i32, i32, i32
  }
}

</mosaic_0001>

<bundles_post_ra>
// kernel: basic_block_forward.2
= control target key start
LH: loop header
LB: loop body
LE: loop exit
PB: predicated region body
PF: predicated region fallthrough
CT: control target
= control target key end

     0   :  { %s2257_s12 = smov 0   ;;  %s2259_s13 = smov 0   ;;  %s2535_s0 = inlined_call_operand.vmem [shape: bf16[8,9,9,4], index: 0, kind: input, shape index: {}]   ;;  %s2536_s1 = inlined_call_operand.vmem [shape: bf16[9,4,128], index: 1, kind: input, shape index: {}]   ;;  %s2537_s2 = inlined_call_operand.vmem [shape: f32[1,128], index: 2, kind: input, shape index: {}]   ;;  %s2538_s3 = inlined_call_operand.vmem [shape: bf16[2,8,8,128], index: 3, kind: output, shape index: {}]  }
   0x1   :  { %s2261_s14 = smov 0  }
   0x2 LB: > { %s25_s15 = sadd.s32 1, %s2231_s13  ;;  %p1769_p0 = scmp.ge.s32.totalorder %s2235_s14, 1  ;;  %s2235_s14 = sphi %s2261_s14, %s13_s14   ;;  %s2231_s13 = sphi %s2259_s13, %s2542_s13   ;;  %s2227_s12 = sphi %s2257_s12, %s2541_s12  }
   0x3   : > { %p27_p1 = scmp.ge.s32.totalorder %s25_s15, 2  ;;  %p170_p2 = scmp.lt.s32.totalorder %s2235_s14, 3 }
   0x5   : > { %s2544_s15 = smov (%p27_p1, %s25_s15), 0  ;;  %p171_p3 = pnand %p1769_p0, %p170_p2 }
   0x6   : > { %v1782_v0 = vld [vmem:[%s2536_s1 + $0x2] sm:$0x3] (!%p171_p3)  ;;  %vm281_vm0 = vcmask (!%p171_p3), 1041408   ;;  %v2283_v1 = vld [vmem:[%s2536_s1 + $0x8] sm:$0x3] (!%p171_p3)  ;;  %s1770_s20 = sshll.u32 (!%p171_p3), %s2227_s12, 2 }
   0x7   : > { %174 = sbr.rel (%p171_p3) target bundleno = 319 (0x13f), region = 32  ;;  %2154 = vmatprep.subr.msk.bf16.mxu1 (!%p171_p3), %vm281_vm0, %v1782_v0  ;;  %2158 = vmatprep.subr.msk.bf16.mxu0 (!%p171_p3), %vm281_vm0, %v2283_v1  ;;  %v283_v2 = vsel (!%p171_p3), %vm281_vm0, %v1782_v0, 0  ;;  %v2292_v3 = vsel (!%p171_p3), %vm281_vm0, %v2283_v1, 0  ;;  %p206_p4 = scmp.lt.s32.totalorder (!%p171_p3), %s1770_s20, 7  ;;  %v236_v4 = vld [vmem:[%s2536_s1] sm:$0x3] (!%p171_p3) }
   0x8   : > { %1999 = vmatpush3.bf16.msra.mxu1 (!%p171_p3), %v283_v2  ;;  %2039 = vmatpush3.bf16.msra.mxu0 (!%p171_p3), %v2292_v3  ;;  %v1858_v5 = vld [vmem:[%s2536_s1 + $0xa] sm:$0x3] (!%p171_p3)  ;;  %vm268_vm1 = vcmask (!%p171_p3), 31744   ;;  %v383_v6 = vsel (!%p171_p3), %vm281_vm0, %v236_v4, 0  ;;  %v1875_v9 = vld [vmem:[%s2536_s1 + $0xc] sm:$0x3] (!%p171_p3) }
   0x9   : > { %2155 = vmatprep.subr.msk.bf16.mxu1 (!%p171_p3), %vm281_vm0, %v236_v4  ;;  %2160 = vmatprep.subr.msk.bf16.mxu0 (!%p171_p3), %vm281_vm0, %v1858_v5  ;;  %v1076_v7 = vsel (!%p171_p3), %vm281_vm0, %v1858_v5, 0  ;;  %v1799_v10 = vld [vmem:[%s2536_s1 + $0x4] sm:$0x3] (!%p171_p3)  ;;  %vm466_vm2 = vsmask.f32 (!%p171_p3), 3328  ;;  %v2326_v15 = vsel (!%p171_p3), %vm281_vm0, %v1875_v9, 0 }
   0xa   : > { %vm467_vm3 = vsmask.f32 (!%p171_p3), 7440  ;;  %v2329_v16 = vsel (!%p171_p3), %vm281_vm0, %v1799_v10, 0  ;;  %p219_p5 = scmp.lt.s32.totalorder (!%p171_p3), %s2227_s12, 1 }
   0xb   : > { %vm2346_vm4 = vmor (!%p171_p3), %vm466_vm2, %vm467_vm3 }
   0xe   : > { %s2546_s20 = smov (!%p206_p4, %s1770_s20), 7  ;;  %s2548_s12 = smov (!%p219_p5, %s2227_s12), 1 }
   0xf   : > { %s2164_s25 = smul.u32 72, %s2546_s20  ;;  %s1929_s18 = sshll.u32 %s2548_s12, 5 }
  0x10   : > { %s226_s21 = scalar_lea.vmem %s2538_s3, %s1929_s18 }
  0x11   : > { %s2306_s28 = scalar_lea.vmem %s2535_s0, %s2164_s25 }
  0x12   : > { %v2189_v8 = vld [vmem:[%s2306_s28 + $0x48] ss:$8 sps:$4 sm:$0xff]   ;;  %v2190_v11 = vld [vmem:[%s2306_s28 + $0xd8] ss:$8 sps:$4 sm:$0xff]   ;;  %v1843_v19 = vld [vmem:[%s2306_s28 + $0x94] sm:$0x1] }
  0x13   : > { %2000 = vmatprep.mubr.msk.bf16.mxu1 %vm268_vm1, %v2189_v8  ;;  %v2191_v12 = vld [vmem:[%s2306_s28 + $0x58] ss:$8 sps:$4 sm:$0xff]   ;;  %2040 = vmatprep.mubr.msk.bf16.mxu0 %vm268_vm1, %v2190_v11  ;;  %v2192_v13 = vld [vmem:[%s2306_s28 + $0xe8] ss:$8 sps:$4 sm:$0xff]   ;;  %v1845_v21 = vld [vmem:[%s2306_s28 + $0x9c] sm:$0x1] }
  0x14   : > { %2001 = vmatmul.mubr.msk.bf16.vlgmr.msra.gmra.mrb[0].mxu1 %vm268_vm1, %v2191_v12  ;;  %v2193_v14 = vld [vmem:[%s2306_s28 + $0x68] ss:$8 sps:$4 sm:$0xff]   ;;  %2041 = vmatmul.mubr.msk.bf16.vlgmr.msra.gmra.mrb[0].mxu0 %vm268_vm1, %v2192_v13  ;;  %v2194_v17 = vld [vmem:[%s2306_s28 + $0x78] ss:$8 sps:$4 sm:$0xff]   ;;  %v947_v24 = vshll.u32 %v1843_v19, 16  ;;  %v961_v27 = vshll.u32 %v1845_v21, 16 }
  0x15   : > { %2009 = vmatpush3.bf16.msra.mxu1 %v383_v6  ;;  %2049 = vmatpush3.bf16.msra.mxu0 %v1076_v7  ;;  %v1842_v18 = vld [vmem:[%s2306_s28 + $0x90] sm:$0xf]  ;;  %v1844_v20 = vld [vmem:[%s2306_s28 + $0x98] sm:$0xf]  ;;  %v1846_v28 = vld [vmem:[%s2306_s28 + $0xa0] sm:$0xf] }
  0x16   : > { %2004 = vmatprep.mubr.msk.bf16.mxu1 %vm268_vm1, %v2193_v14  ;;  %v938_v22 = vshrl.u32 %v1842_v18, 16  ;;  %v941_v23 = vshll.u32 %v1842_v18, 16  ;;  %v952_v25 = vshrl.u32 %v1844_v20, 16  ;;  %2161 = vmatprep.subr.msk.bf16.mxu0 %vm281_vm0, %v1875_v9  ;;  %v955_v26 = vshll.u32 %v1844_v20, 16  ;;  %v1847_v29 = vld [vmem:[%s2306_s28 + $0xa4] sm:$0x1] }
  0x17   : > { %2156 = vmatprep.subr.msk.bf16.mxu1 %vm281_vm0, %v1799_v10  ;;  %v949_v32 = vrot.slane %v947_v24, 5  ;;  %v1848_v34 = vld [vmem:[%s2306_s28 + $0xa8] sm:$0xf]  ;;  %v963_v36 = vrot.slane %v961_v27, 5  ;;  %v1849_v37 = vld [vmem:[%s2306_s28 + $0xac] sm:$0x1] }
  0x18   : > { %v940_v30 = vrot.slane %v938_v22, 4  ;;  %v943_v31 = vrot.slane %v941_v23, 5  ;;  %v954_v33 = vrot.slane %v952_v25, 4  ;;  %v957_v35 = vrot.slane %v955_v26, 5  ;;  %v2195_v53 = vld [vmem:[%s2306_s28] ss:$8 sps:$4 sm:$0xff]  }
  0x19   : > { %v966_v38 = vshrl.u32 %v1846_v28, 16  ;;  %v969_v39 = vshll.u32 %v1846_v28, 16  ;;  %v975_v41 = vshll.u32 %v1847_v29, 16  ;;  %v980_v42 = vshrl.u32 %v1848_v34, 16  ;;  %v2196_v59 = vld [vmem:[%s2306_s28 + $0x10] ss:$8 sps:$4 sm:$0xff]  }
  0x1a   : > { %v944_v40 = vor.u32 %v943_v31, %v940_v30  ;;  %v983_v43 = vshll.u32 %v1848_v34, 16  ;;  %v958_v45 = vor.u32 %v957_v35, %v954_v33  ;;  %v989_v48 = vshll.u32 %v1849_v37, 16  ;;  %v1850_v60 = vld [vmem:[%s2306_s28 + $0xb0] sm:$0xf]  ;;  %v1851_v61 = vld [vmem:[%s2306_s28 + $0xb4] sm:$0x1] }
  0x1b   : > { %v968_v46 = vrot.slane %v966_v38, 4  ;;  %v971_v47 = vrot.slane %v969_v39, 5  ;;  %v977_v50 = vrot.slane %v975_v41, 5  ;;  %v982_v51 = vrot.slane %v980_v42, 4  ;;  %v1852_v0 = vld [vmem:[%s2306_s28 + $0xb8] sm:$0xf] }
  0x1c   : > { %2005 = vmatmul.mubr.msk.bf16.gmra.mrb[4].mxu1 %vm268_vm1, %v2194_v17  ;;  %v945_v49 = vrot.slane %v944_v40, 4  ;;  %v985_v52 = vrot.slane %v983_v43, 5  ;;  %v959_v54 = vrot.slane %v958_v45, 4  ;;  %v991_v56 = vrot.slane %v989_v48, 5  ;;  %v1853_v2 = vld [vmem:[%s2306_s28 + $0xbc] sm:$0x1] }
  0x1d   : > { %v972_v55 = vor.u32 %v971_v47, %v968_v46  ;;  %2010 = vmatprep.mubr.msk.bf16.mxu1 %vm268_vm1, %v2195_v53  ;;  %v994_v4 = vshrl.u32 %v1850_v60, 16  ;;  %v997_v7 = vshll.u32 %v1850_v60, 16  ;;  %v1003_v8 = vshll.u32 %v1851_v61, 16  ;;  %v1854_v9 = vld [vmem:[%s2306_s28 + $0xc0] sm:$0xf] }
  0x1e   : > { %v950_v57 = vsel %vm2346_vm4, %v945_v49, %v949_v32  ;;  %v986_v58 = vor.u32 %v985_v52, %v982_v51  ;;  %v964_v62 = vsel %vm2346_vm4, %v959_v54, %v963_v36  ;;  %v2365_v10 = vld [vmem:[%s2536_s1 + $0x6] sm:$0x3]  ;;  %v1008_v13 = vshrl.u32 %v1852_v0, 16  ;;  %v1855_v17 = vld [vmem:[%s2306_s28 + $0xc4] sm:$0x1] }
  0x1f   : > { %v973_v63 = vrot.slane %v972_v55, 4  ;;  %v1859_v5 = vcombine.low %v950_v57, %v964_v62  ;;  %v996_v12 = vrot.slane %v994_v4, 4  ;;  %v1011_v14 = vshll.u32 %v1852_v0, 16  ;;  %v1856_v22 = vld [vmem:[%s2306_s28 + $0xc8] sm:$0xf] }
  0x20   : > { %v987_v6 = vrot.slane %v986_v58, 4  ;;  %v999_v19 = vrot.slane %v997_v7, 5  ;;  %v1005_v20 = vrot.slane %v1003_v8, 5  ;;  %v1017_v21 = vshll.u32 %v1853_v2, 16  ;;  %v2377_v23 = vld [vmem:[%s2536_s1 + $0xe] sm:$0x3] }
  0x21   : > { %v978_v11 = vsel %vm2346_vm4, %v973_v63, %v977_v50  ;;  %2050 = vmatprep.mubr.msk.bf16.mxu0 %vm268_vm1, %v1859_v5  ;;  %v1010_v25 = vrot.slane %v1008_v13, 4  ;;  %v1013_v26 = vrot.slane %v1011_v14, 5  ;;  %v1857_v27 = vld [vmem:[%s2306_s28 + $0xcc] sm:$0x1]  ;;  %v1022_v28 = vshrl.u32 %v1854_v9, 16 }
  0x22   : > { %v992_v18 = vsel %vm2346_vm4, %v987_v6, %v991_v56  ;;  %v1000_v29 = vor.u32 %v999_v19, %v996_v12  ;;  %v1019_v30 = vrot.slane %v1017_v21, 5  ;;  %v1025_v31 = vshll.u32 %v1854_v9, 16  ;;  %v2199_v53 = vld [vmem:[%s2306_s28 + $0x8] ss:$8 sps:$4 sm:$0xff]   ;;  %v450_v54 = vld [vmem:[%s2306_s28] sm:$0xf] }
  0x23   : > { %v1860_v24 = vcombine.low %v978_v11, %v992_v18  ;;  %v1031_v32 = vshll.u32 %v1855_v17, 16  ;;  %v1014_v33 = vor.u32 %v1013_v26, %v1010_v25  ;;  %v1024_v34 = vrot.slane %v1022_v28, 4  ;;  %v451_v56 = vld [vmem:[%s2306_s28 + $0x4] sm:$0x1]  ;;  %v452_v57 = vld [vmem:[%s2306_s28 + $0x8] sm:$0xf] }
  0x24   : > { %2011 = vmatmul.mubr.msk.bf16.vlgmr.msra.gmra.mrb[0].mxu1 %vm268_vm1, %v2196_v59  ;;  %v1036_v35 = vshrl.u32 %v1856_v22, 16  ;;  %v1039_v36 = vshll.u32 %v1856_v22, 16  ;;  %v1001_v37 = vrot.slane %v1000_v29, 4  ;;  %v1027_v38 = vrot.slane %v1025_v31, 5  ;;  %v453_v58 = vld [vmem:[%s2306_s28 + $0xc] sm:$0x1] }
  0x25   : > { %2019 = vmatpush3.bf16.msra.mxu1 %v2329_v16  ;;  %2051 = vmatmul.mubr.msk.bf16.vlgmr.msra.gmra.mrb[0].mxu0 %vm268_vm1, %v1860_v24  ;;  %v1045_v39 = vshll.u32 %v1857_v27, 16  ;;  %v2197_v16 = vld [vmem:[%s2306_s28 + $0x20] ss:$8 sps:$4 sm:$0xff]   ;;  %v1015_v40 = vrot.slane %v1014_v33, 4  ;;  %v1033_v46 = vrot.slane %v1031_v32, 5  ;;  %v470_v60 = vshrl.u32 %v450_v54, 16 }
  0x26   : > { %2157 = vmatprep.subr.msk.bf16.mxu1 %vm281_vm0, %v2365_v10  ;;  %2059 = vmatpush3.bf16.msra.mxu0 %v2326_v15  ;;  %v1038_v41 = vrot.slane %v1036_v35, 4  ;;  %v1041_v42 = vrot.slane %v1039_v36, 5  ;;  %v1006_v43 = vsel %vm2346_vm4, %v1001_v37, %v1005_v20  ;;  %v1028_v45 = vor.u32 %v1027_v38, %v1024_v34  ;;  %v2198_v15 = vld [vmem:[%s2306_s28 + $0x30] ss:$8 sps:$4 sm:$0xff]   ;;  %v455_v6 = vld [vmem:[%s2306_s28 + $0x14] sm:$0x1] }
  0x27   : > { %2162 = vmatprep.subr.msk.bf16.mxu0 %vm281_vm0, %v2377_v23  ;;  %2014 = vmatprep.mubr.msk.bf16.mxu1 %vm268_vm1, %v2197_v16  ;;  %v1020_v47 = vsel %vm2346_vm4, %v1015_v40, %v1019_v30  ;;  %v1047_v49 = vrot.slane %v1045_v39, 5  ;;  %v473_v61 = vshll.u32 %v450_v54, 16  ;;  %v479_v62 = vshll.u32 %v451_v56, 16  ;;  %v454_v63 = vld [vmem:[%s2306_s28 + $0x10] sm:$0xf] }
  0x28   : > { %v1042_v48 = vor.u32 %v1041_v42, %v1038_v41  ;;  %v1861_v50 = vcombine.low %v1006_v43, %v1020_v47  ;;  %v1029_v51 = vrot.slane %v1028_v45, 4  ;;  %v484_v2 = vshrl.u32 %v452_v57, 16  ;;  %v456_v11 = vld [vmem:[%s2306_s28 + $0x18] sm:$0xf]  ;;  %v457_v18 = vld [vmem:[%s2306_s28 + $0x1c] sm:$0x1] }
  0x29   : > { %v487_v4 = vshll.u32 %v452_v57, 16  ;;  %v493_v5 = vshll.u32 %v453_v58, 16  ;;  %v472_v7 = vrot.slane %v470_v60, 4  ;;  %v475_v8 = vrot.slane %v473_v61, 5  ;;  %v2200_v29 = vld [vmem:[%s2306_s28 + $0x18] ss:$8 sps:$4 sm:$0xff]  }
  0x2a   : > { %v1043_v52 = vrot.slane %v1042_v48, 4  ;;  %2054 = vmatprep.mubr.msk.bf16.mxu0 %vm268_vm1, %v1861_v50  ;;  %v1034_v55 = vsel %vm2346_vm4, %v1029_v51, %v1033_v46  ;;  %v481_v9 = vrot.slane %v479_v62, 5  ;;  %v498_v12 = vshrl.u32 %v454_v63, 16  ;;  %v2201_v37 = vld [vmem:[%s2306_s28 + $0x28] ss:$8 sps:$4 sm:$0xff]  }
  0x2b   : > { %v486_v13 = vrot.slane %v484_v2, 4  ;;  %v489_v14 = vrot.slane %v487_v4, 5  ;;  %v495_v17 = vrot.slane %v493_v5, 5  ;;  %v501_v19 = vshll.u32 %v454_v63, 16  ;;  %v458_v40 = vld [vmem:[%s2306_s28 + $0x20] sm:$0xf] }
  0x2c   : > { %2015 = vmatmul.mubr.msk.bf16.gmra.mrb[4].mxu1 %vm268_vm1, %v2198_v15  ;;  %v1048_v59 = vsel %vm2346_vm4, %v1043_v52, %v1047_v49  ;;  %v476_v20 = vor.u32 %v475_v8, %v472_v7  ;;  %v500_v21 = vrot.slane %v498_v12, 4  ;;  %v507_v22 = vshll.u32 %v455_v6, 16  ;;  %v459_v45 = vld [vmem:[%s2306_s28 + $0x24] sm:$0x1]  ;;  %v460_v46 = vld [vmem:[%s2306_s28 + $0x28] sm:$0xf] }
  0x2d   : > { %v1862_v0 = vcombine.low %v1034_v55, %v1048_v59  ;;  %v512_v24 = vshrl.u32 %v456_v11, 16  ;;  %v490_v25 = vor.u32 %v489_v14, %v486_v13  ;;  %v503_v26 = vrot.slane %v501_v19, 5  ;;  %v461_v48 = vld [vmem:[%s2306_s28 + $0x2c] sm:$0x1]  ;;  %v462_v55 = vld [vmem:[%s2306_s28 + $0x30] sm:$0xf] }
  0x2e   : > { %v515_v27 = vshll.u32 %v456_v11, 16  ;;  %v521_v28 = vshll.u32 %v457_v18, 16  ;;  %v1314_v30 = vsel %vm281_vm0, %v2377_v23, 0  ;;  %v477_v31 = vrot.slane %v476_v20, 4  ;;  %v2424_v23 = vld [vmem:[%s2536_s1 + $0x10] sm:$0x3] }
  0x2f   : > { %2055 = vmatmul.mubr.msk.bf16.gmra.mrb[4].mxu0 %vm268_vm1, %v1862_v0  ;;  %v509_v32 = vrot.slane %v507_v22, 5  ;;  %v514_v33 = vrot.slane %v512_v24, 4  ;;  %v491_v34 = vrot.slane %v490_v25, 4  ;;  %v504_v35 = vor.u32 %v503_v26, %v500_v21  ;;  %v463_v60 = vld [vmem:[%s2306_s28 + $0x34] sm:$0x1] }
  0x30   : > { %2060 = vmatprep.mubr.msk.bf16.mxu0 %vm268_vm1, %v2199_v53  ;;  %v517_v36 = vrot.slane %v515_v27, 5  ;;  %v482_v38 = vsel %vm2346_vm4, %v477_v31, %v481_v9  ;;  %v523_v39 = vrot.slane %v521_v28, 5  ;;  %v727_v16 = vsel %vm281_vm0, %v2365_v10, 0  ;;  %v2202_v62 = vld [vmem:[%s2306_s28 + $0x38] ss:$8 sps:$4 sm:$0xff]  }
  0x31   : > { %v496_v41 = vsel %vm2346_vm4, %v491_v34, %v495_v17  ;;  %v505_v42 = vrot.slane %v504_v35, 4  ;;  %v526_v15 = vshrl.u32 %v458_v40, 16  ;;  %v529_v49 = vshll.u32 %v458_v40, 16  ;;  %v464_v0 = vld [vmem:[%s2306_s28 + $0x38] sm:$0xf] }
  0x32   : > { %v518_v43 = vor.u32 %v517_v36, %v514_v33  ;;  %v1800_v47 = vcombine.low %v482_v38, %v496_v41  ;;  %v535_v10 = vshll.u32 %v459_v45, 16  ;;  %v540_v50 = vshrl.u32 %v460_v46, 16  ;;  %v465_v2 = vld [vmem:[%s2306_s28 + $0x3c] sm:$0x1]  ;;  %v2203_v14 = vld [vmem:[%s2306_s28 + $0x50] ss:$8 sps:$4 sm:$0xff]  }
  0x33   : > { %v510_v51 = vsel %vm2346_vm4, %v505_v42, %v509_v32  ;;  %v528_v53 = vrot.slane %v526_v15, 4  ;;  %v543_v54 = vshll.u32 %v460_v46, 16  ;;  %v531_v56 = vrot.slane %v529_v49, 5  ;;  %v2204_v35 = vld [vmem:[%s2306_s28 + $0x60] ss:$8 sps:$4 sm:$0xff]  }
  0x34   : > { %v519_v52 = vrot.slane %v518_v43, 4  ;;  %2020 = vmatprep.mubr.msk.bf16.mxu1 %vm268_vm1, %v1800_v47  ;;  %v537_v57 = vrot.slane %v535_v10, 5  ;;  %v542_v58 = vrot.slane %v540_v50, 4  ;;  %v549_v59 = vshll.u32 %v461_v48, 16  ;;  %v1902_v40 = vld [vmem:[%s2306_s28 + $0xc] sm:$0x1] }
  0x35   : > { %v545_v63 = vrot.slane %v543_v54, 5  ;;  %v554_v4 = vshrl.u32 %v462_v55, 16  ;;  %v532_v6 = vor.u32 %v531_v56, %v528_v53  ;;  %v557_v8 = vshll.u32 %v462_v55, 16  ;;  %v1903_v41 = vld [vmem:[%s2306_s28 + $0x10] sm:$0xf] }
  0x36   : > { %v524_v61 = vsel %vm2346_vm4, %v519_v52, %v523_v39  ;;  %v551_v7 = vrot.slane %v549_v59, 5  ;;  %v563_v12 = vshll.u32 %v463_v60, 16  ;;  %v568_v13 = vshrl.u32 %v464_v0, 16  ;;  %v2207_v39 = vld [vmem:[%s2306_s28 + $0x70] ss:$8 sps:$4 sm:$0xff]  }
  0x37   : > { %2061 = vmatmul.mubr.msk.bf16.vlgmr.msra.gmra.mrb[0].mxu0 %vm268_vm1, %v2200_v29  ;;  %v1801_v5 = vcombine.low %v510_v51, %v524_v61  ;;  %v546_v9 = vor.u32 %v545_v63, %v542_v58  ;;  %v556_v11 = vrot.slane %v554_v4, 4  ;;  %v533_v17 = vrot.slane %v532_v6, 4  ;;  %v1904_v42 = vld [vmem:[%s2306_s28 + $0x14] sm:$0x1]  ;;  %v1905_v48 = vld [vmem:[%s2306_s28 + $0x18] sm:$0xf] }
  0x38   : > { %2069 = vmatpush3.bf16.msra.mxu0 %v1314_v30  ;;  %2064 = vmatprep.mubr.msk.bf16.mxu0 %vm268_vm1, %v2201_v37  ;;  %v559_v18 = vrot.slane %v557_v8, 5  ;;  %v571_v19 = vshll.u32 %v464_v0, 16  ;;  %v577_v20 = vshll.u32 %v465_v2, 16  ;;  %v570_v22 = vrot.slane %v568_v13, 4  ;;  %v2205_v37 = vld [vmem:[%s2306_s28 + $0x90] ss:$8 sps:$4 sm:$0xff]  }
  0x39   : > { %2163 = vmatprep.subr.msk.bf16.mxu0 %vm281_vm0, %v2424_v23  ;;  %2021 = vmatmul.mubr.msk.bf16.vlgmr.msra.gmra.mrb[0].mxu1 %vm268_vm1, %v1801_v5  ;;  %v547_v21 = vrot.slane %v546_v9, 4  ;;  %v538_v24 = vsel %vm2346_vm4, %v533_v17, %v537_v57  ;;  %v565_v26 = vrot.slane %v563_v12, 5  ;;  %v1544_v34 = vsel %vm281_vm0, %v2424_v23, 0  ;;  %v1906_v50 = vld [vmem:[%s2306_s28 + $0x1c] sm:$0x1] }
  0x3a   : > { %2029 = vmatpush3.bf16.msra.mxu1 %v727_v16  ;;  %v560_v25 = vor.u32 %v559_v18, %v556_v11  ;;  %v573_v27 = vrot.slane %v571_v19, 5  ;;  %v579_v32 = vrot.slane %v577_v20, 5  ;;  %v1901_v16 = vld [vmem:[%s2306_s28 + $0x8] sm:$0xf]  ;;  %v1415_v23 = vshll.u32 %v1902_v40, 16 }
  0x3b   : > { %2159 = vmatprep.subr.msk.bf16.mxu1 %vm281_vm0, %v2283_v1  ;;  %v552_v28 = vsel %vm2346_vm4, %v547_v21, %v551_v7  ;;  %v1406_v43 = vshrl.u32 %v1901_v16, 16  ;;  %v1409_v45 = vshll.u32 %v1901_v16, 16  ;;  %v1420_v46 = vshrl.u32 %v1903_v41, 16  ;;  %v1907_v51 = vld [vmem:[%s2306_s28 + $0x20] sm:$0xf] }
  0x3c   : > { %v1802_v29 = vcombine.low %v538_v24, %v552_v28  ;;  %v561_v30 = vrot.slane %v560_v25, 4  ;;  %v574_v31 = vor.u32 %v573_v27, %v570_v22  ;;  %v1423_v15 = vshll.u32 %v1903_v41, 16  ;;  %v2206_v52 = vld [vmem:[%s2306_s28 + $0xa0] ss:$8 sps:$4 sm:$0xff]   ;;  %v1908_v58 = vld [vmem:[%s2306_s28 + $0x24] sm:$0x1] }
  0x3d   : > { %v1429_v47 = vshll.u32 %v1904_v42, 16  ;;  %v1408_v49 = vrot.slane %v1406_v43, 4  ;;  %v1411_v10 = vrot.slane %v1409_v45, 5  ;;  %v2208_v53 = vld [vmem:[%s2306_s28 + $0x80] ss:$8 sps:$4 sm:$0xff]   ;;  %v1417_v54 = vrot.slane %v1415_v23, 5 }
  0x3e   : > { %2024 = vmatprep.mubr.msk.bf16.mxu1 %vm268_vm1, %v1802_v29  ;;  %v566_v1 = vsel %vm2346_vm4, %v561_v30, %v565_v26  ;;  %v575_v33 = vrot.slane %v574_v31, 4  ;;  %v1422_v55 = vrot.slane %v1420_v46, 4  ;;  %v1425_v56 = vrot.slane %v1423_v15, 5  ;;  %v2209_v5 = vld [vmem:[%s2306_s28 + $0xb0] ss:$8 sps:$4 sm:$0xff]  }
  0x3f   : > { %2065 = vmatmul.mubr.msk.bf16.gmra.mrb[4].mxu0 %vm268_vm1, %v2202_v62  ;;  %v1431_v57 = vrot.slane %v1429_v47, 5  ;;  %v1412_v59 = vor.u32 %v1411_v10, %v1408_v49  ;;  %v1434_v60 = vshrl.u32 %v1905_v48, 16  ;;  %v1437_v61 = vshll.u32 %v1905_v48, 16  ;;  %v1909_v17 = vld [vmem:[%s2306_s28 + $0x28] sm:$0xf] }
  0x40   : > { %2070 = vmatprep.mubr.msk.bf16.mxu0 %vm268_vm1, %v2203_v14  ;;  %v580_v36 = vsel %vm2346_vm4, %v575_v33, %v579_v32  ;;  %v1443_v62 = vshll.u32 %v1906_v50, 16  ;;  %v1426_v63 = vor.u32 %v1425_v56, %v1422_v55  ;;  %v1448_v0 = vshrl.u32 %v1907_v51, 16  ;;  %v1910_v20 = vld [vmem:[%s2306_s28 + $0x2c] sm:$0x1]  ;;  %v1911_v21 = vld [vmem:[%s2306_s28 + $0x30] sm:$0xf] }
  0x41   : > { %v1803_v38 = vcombine.low %v566_v1, %v580_v36  ;;  %v1451_v2 = vshll.u32 %v1907_v51, 16  ;;  %v1457_v4 = vshll.u32 %v1908_v58, 16  ;;  %v1413_v6 = vrot.slane %v1412_v59, 4  ;;  %v1912_v22 = vld [vmem:[%s2306_s28 + $0x34] sm:$0x1] }
  0x42   : > { %v1436_v7 = vrot.slane %v1434_v60, 4  ;;  %v1439_v8 = vrot.slane %v1437_v61, 5  ;;  %v1445_v9 = vrot.slane %v1443_v62, 5  ;;  %v1427_v11 = vrot.slane %v1426_v63, 4  ;;  %v2210_v32 = vld [vmem:[%s2306_s28 + $0xc0] ss:$8 sps:$4 sm:$0xff]  }
  0x43   : > { %2025 = vmatmul.mubr.msk.bf16.gmra.mrb[4].mxu1 %vm268_vm1, %v1803_v38  ;;  %v1450_v12 = vrot.slane %v1448_v0, 4  ;;  %v1453_v13 = vrot.slane %v1451_v2, 5  ;;  %v1459_v14 = vrot.slane %v1457_v4, 5  ;;  %v1418_v18 = vsel %vm2346_vm4, %v1413_v6, %v1417_v54  ;;  %v1913_v36 = vld [vmem:[%s2306_s28 + $0x38] sm:$0xf] }
  0x44   : > { %2030 = vmatprep.mubr.msk.bf16.mxu1 %vm268_vm1, %v2205_v37  ;;  %v1440_v19 = vor.u32 %v1439_v8, %v1436_v7  ;;  %v1432_v24 = vsel %vm2346_vm4, %v1427_v11, %v1431_v57  ;;  %v1462_v26 = vshrl.u32 %v1909_v17, 16  ;;  %v1465_v27 = vshll.u32 %v1909_v17, 16  ;;  %v1914_v16 = vld [vmem:[%s2306_s28 + $0x3c] sm:$0x1]  ;;  %v1915_v43 = vld [vmem:[%s2306_s28 + $0x40] sm:$0xf] }
  0x45   : > { %v1454_v25 = vor.u32 %v1453_v13, %v1450_v12  ;;  %v1918_v28 = vcombine.low %v1418_v18, %v1432_v24  ;;  %v1471_v30 = vshll.u32 %v1910_v20, 16  ;;  %v1476_v31 = vshrl.u32 %v1911_v21, 16  ;;  %v1916_v45 = vld [vmem:[%s2306_s28 + $0x44] sm:$0x1]  ;;  %v2211_v15 = vld [vmem:[%s2306_s28 + $0xf8] ss:$8 sps:$4 sm:$0xff]  }
  0x46   : > { %v1441_v29 = vrot.slane %v1440_v19, 4  ;;  %v1464_v33 = vrot.slane %v1462_v26, 4  ;;  %v1490_v23 = vshrl.u32 %v1913_v36, 16  ;;  %v1493_v48 = vshll.u32 %v1913_v36, 16  ;;  %v2212_v8 = vld [vmem:[%s2306_s28 + $0x108] ss:$8 sps:$4 sm:$0xff]  }
  0x47   : > { %2071 = vmatmul.mubr.msk.bf16.vlgmr.msra.gmra.mrb[0].mxu0 %vm268_vm1, %v2204_v35  ;;  %v1455_v1 = vrot.slane %v1454_v25, 4  ;;  %v1479_v35 = vshll.u32 %v1911_v21, 16  ;;  %v1473_v37 = vrot.slane %v1471_v30, 5  ;;  %v1478_v38 = vrot.slane %v1476_v31, 4  ;;  %v1926_v18 = vld [vmem:[%s2537_s2] ss:$0 sm:$0xff] }
  0x48   : > { %2079 = vmatpush3.bf16.msra.mxu0 %v1544_v34  ;;  %2074 = vmatprep.mubr.msk.bf16.mxu0 %vm268_vm1, %v2207_v39  ;;  %v1467_v34 = vrot.slane %v1465_v27, 5  ;;  %v1485_v39 = vshll.u32 %v1912_v22, 16  ;;  %v1499_v49 = vshll.u32 %v1914_v16, 16  ;;  %v1492_v51 = vrot.slane %v1490_v23, 4 }
  0x49   : > { %v1460_v40 = vsel %vm2346_vm4, %v1455_v1, %v1459_v14  ;;  %v1481_v42 = vrot.slane %v1479_v35, 5  ;;  %v1507_v54 = vshll.u32 %v1915_v43, 16  ;;  %v1513_v55 = vshll.u32 %v1916_v45, 16 }
  0x4a   : > { %v1468_v41 = vor.u32 %v1467_v34, %v1464_v33  ;;  %v1487_v47 = vrot.slane %v1485_v39, 5  ;;  %v1501_v60 = vrot.slane %v1499_v49, 5 }
  0x4b   : > { %2031 = vmatmul.mubr.msk.bf16.vlgmr.msra.gmra.mrb[0].mxu1 %vm268_vm1, %v2206_v52  ;;  %v1482_v50 = vor.u32 %v1481_v42, %v1478_v38  ;;  %v1504_v52 = vshrl.u32 %v1915_v43, 16  ;;  %v1509_v61 = vrot.slane %v1507_v54, 5  ;;  %v1515_v4 = vrot.slane %v1513_v55, 5 }
  0x4c   : > { %2089 = vmatpush3.bf16.msra.mxu1 %v2292_v3  ;;  %2034 = vmatprep.mubr.msk.bf16.mxu1 %vm268_vm1, %v2209_v5  ;;  %v1446_v3 = vsel %vm2346_vm4, %v1441_v29, %v1445_v9  ;;  %v1469_v10 = vrot.slane %v1468_v41, 4 }
  0x4d   : > { %v1919_v46 = vcombine.low %v1446_v3, %v1460_v40  ;;  %v1483_v57 = vrot.slane %v1482_v50, 4  ;;  %v1506_v58 = vrot.slane %v1504_v52, 4 }
  0x4e   : > { %v1474_v56 = vsel %vm2346_vm4, %v1469_v10, %v1473_v37 }
  0x4f   : > { %2075 = vmatmul.mubr.msk.bf16.gmra.mrb[4].mxu0 %vm268_vm1, %v2208_v53  ;;  %v1495_v53 = vrot.slane %v1493_v48, 5  ;;  %v1488_v62 = vsel %vm2346_vm4, %v1483_v57, %v1487_v47  ;;  %v1510_v2 = vor.u32 %v1509_v61, %v1506_v58 }
  0x50   : > { %2080 = vmatprep.mubr.msk.bf16.mxu0 %vm268_vm1, %v1918_v28  ;;  %v1920_v63 = vcombine.low %v1474_v56, %v1488_v62 }
  0x51   : > { %v1496_v59 = vor.u32 %v1495_v53, %v1492_v51  ;;  %v1511_v6 = vrot.slane %v1510_v2, 4 }
  0x53   : > { %2035 = vmatmul.mubr.msk.bf16.gmra.mrb[4].mxu1 %vm268_vm1, %v2210_v32  ;;  %v1497_v0 = vrot.slane %v1496_v59, 4  ;;  %v1516_v7 = vsel %vm2346_vm4, %v1511_v6, %v1515_v4 }
  0x54   : > { %2044 = vmatprep.mubr.msk.bf16.mxu1 %vm268_vm1, %v2211_v15 }
  0x55   : > { %v1502_v5 = vsel %vm2346_vm4, %v1497_v0, %v1501_v60 }
  0x56   : > { %v1921_v9 = vcombine.low %v1502_v5, %v1516_v7 }
  0x57   : > { %2081 = vmatmul.mubr.msk.bf16.vlgmr.msra.gmra.mrb[0].mxu0 %vm268_vm1, %v1919_v46 }
  0x58   : > { %2084 = vmatprep.mubr.msk.bf16.mxu0 %vm268_vm1, %v1920_v63 }
  0x5f   : > { %2085 = vmatmul.mubr.msk.bf16.gmra.mrb[4].mxu0 %vm268_vm1, %v1921_v9  ;;  %2045 = vmatmul.mubr.msk.bf16.vlgmr.msra.gmra.mrb[4].mxu1 %vm268_vm1, %v2212_v8 }
 0x11e   : > { %v2032_v11 = vpop.f32.mrb[0].mxu1 }
 0x11f   : > { %v763_v12 = vpop.f32.mrb[1].mxu1 }
 0x120   : > { %v2033_v13 = vpop.f32.mrb[2].mxu1 }
 0x121   : > { %v766_v14 = vpop.f32.mrb[3].mxu1 }
 0x12a   : > { %v2082_v17 = vpop.f32.mrb[0].mxu0 }
 0x12b   : > { %v2090_v19 = vadd.f32 %v2082_v17, %v2032_v11  ;;  %v1580_v20 = vpop.f32.mrb[1].mxu0 }
 0x12c   : > { %v2091_v44 = vadd.f32 %v1580_v20, %v763_v12  ;;  %v2083_v21 = vpop.f32.mrb[2].mxu0 }
 0x12d   : > { %v1628_v22 = vadd.f32 %v2090_v19, %v1926_v18  ;;  %v2092_v24 = vadd.f32 %v2083_v21, %v2033_v13  ;;  %v1583_v25 = vpop.f32.mrb[3].mxu0 }
 0x12e   : > { %v1626_v26 = vadd.f32 %v2091_v44, %v1926_v18  ;;  %v2093_v27 = vadd.f32 %v1583_v25, %v766_v14 }
 0x12f   : > { %v1629_v28 = vadd.f32 %v2092_v24, %v1926_v18  ;;  %v1636_v30 = vmax.f32 %v1628_v22, 0.0 }
 0x130   : > { %v1627_v29 = vadd.f32 %v2093_v27, %v1926_v18  ;;  %v1634_v32 = vmax.f32 %v1626_v26, 0.0 }
 0x131   : > { %v1637_v31 = vmax.f32 %v1629_v28, 0.0 }
 0x132   : > { %v1635_v1 = vmax.f32 %v1627_v29, 0.0  ;;  %v2086_v35 = vpop.f32.mrb[4].mxu0  ;;  %v2046_v3 = vpop.f32.mrb[4].mxu1 }
 0x133   : > { %v1938_v33 = vpack.c.bf16 %v1637_v31, %v1636_v30  ;;  %v1596_v36 = vpop.f32.mrb[5].mxu0  ;;  %v2094_v38 = vadd.f32 %v2086_v35, %v2046_v3  ;;  %v898_v39 = vpop.f32.mrb[5].mxu1 }
 0x134   : > { %v1933_v34 = vpack.c.bf16 %v1635_v1, %v1634_v32  ;;  %v2087_v37 = vpop.f32.mrb[6].mxu0  ;;  %v2095_v40 = vadd.f32 %v1596_v36, %v898_v39  ;;  %v2047_v41 = vpop.f32.mrb[6].mxu1 }
 0x135   : > { %1950 = vst [vmem:[%s226_s21 + $0x8] sm:$0xff] %v1938_v33   ;;  %v1599_v16 = vpop.f32.mrb[7].mxu0  ;;  %v1632_v42 = vadd.f32 %v2094_v38, %v1926_v18  ;;  %v2096_v43 = vadd.f32 %v2087_v37, %v2047_v41  ;;  %v901_v45 = vpop.f32.mrb[7].mxu1 }
 0x136   : > { %1934 = vst [vmem:[%s226_s21] sm:$0xff] %v1933_v34   ;;  %v1630_v23 = vadd.f32 %v2095_v40, %v1926_v18  ;;  %v2097_v46 = vadd.f32 %v1599_v16, %v901_v45 }
 0x137   : > { %v1633_v15 = vadd.f32 %v2096_v43, %v1926_v18  ;;  %v1640_v48 = vmax.f32 %v1632_v42, 0.0 }
 0x138   : > { %v1631_v47 = vadd.f32 %v2097_v46, %v1926_v18  ;;  %v1638_v10 = vmax.f32 %v1630_v23, 0.0 }
 0x139   : > { %v1641_v49 = vmax.f32 %v1633_v15, 0.0 }
 0x13a   : > { %v1639_v50 = vmax.f32 %v1631_v47, 0.0 }
 0x13b   : > { %v1948_v51 = vpack.c.bf16 %v1641_v49, %v1640_v48 }
 0x13c   : > { %v1943_v52 = vpack.c.bf16 %v1639_v50, %v1638_v10 }
 0x13d   : > { %1952 = vst [vmem:[%s226_s21 + $0x18] sm:$0xff] %v1948_v51  }
 0x13e   : > { %1951 = vst [vmem:[%s226_s21 + $0x10] sm:$0xff] %v1943_v52  }
 0x13f PF: > { %s13_s14 = sadd.s32 1, %s2235_s14   ;;  %s2541_s12 = smov %s2231_s13 }
 0x140   : > { %p10_p6 = scmp.ge.s32.totalorder %s13_s14, 4   ;;  %s2542_s13 = smov %s2544_s15 }
 0x142   :  { %12 = sbr.rel (!%p10_p6) target bundleno = 2 (0x2), region = 81 }

// kernel: basic_block_forward.3
= control target key start
LH: loop header
LB: loop body
LE: loop exit
PB: predicated region body
PF: predicated region fallthrough
CT: control target
= control target key end

     0   :  { %s3570_s21 = smov 0   ;;  %s3572_s22 = smov 0   ;;  %s4241_s0 = inlined_call_operand.vmem [shape: bf16[2,10,10,128], index: 0, kind: input, shape index: {}]   ;;  %s4242_s1 = inlined_call_operand.vmem [shape: bf16[9,128,128], index: 1, kind: input, shape index: {}]   ;;  %s4243_s2 = inlined_call_operand.vmem [shape: f32[1,128], index: 2, kind: input, shape index: {}]   ;;  %s4244_s3 = inlined_call_operand.vmem [shape: bf16[2,8,8,4], index: 3, kind: input, shape index: {}]   ;;  %s4245_s4 = inlined_call_operand.vmem [shape: bf16[4,128], index: 4, kind: input, shape index: {}]   ;;  %s4246_s5 = inlined_call_operand.vmem [shape: f32[1,128], index: 5, kind: input, shape index: {}]   ;;  %s4247_s6 = inlined_call_operand.vmem [shape: f32[2,8,8,128], index: 6, kind: output, shape index: {}]  }
   0x1   :  { %s3574_s23 = smov 0  }
   0x2 LB: > { %s28_s24 = sadd.s32 1, %s3529_s22  ;;  %p2641_p0 = scmp.ge.s32.totalorder %s3533_s23, 1  ;;  %s3533_s23 = sphi %s3574_s23, %s16_s23   ;;  %s3529_s22 = sphi %s3572_s22, %s4253_s22   ;;  %s3525_s21 = sphi %s3570_s21, %s4252_s21  }
   0x3   : > { %p30_p1 = scmp.ge.s32.totalorder %s28_s24, 2  ;;  %p270_p2 = scmp.lt.s32.totalorder %s3533_s23, 3 }
   0x5   : > { %s4255_s24 = smov (%p30_p1, %s28_s24), 0  ;;  %p271_p3 = pnand %p2641_p0, %p270_p2 }
   0x6   : > { %v3422_v0 = vld [vmem:[%s4242_s1 + $0x40] sm:$0xff] (!%p271_p3)   ;;  %p322_p4 = scmp.lt.s32.totalorder (!%p271_p3), %s3525_s21, 1  ;;  %v3424_v2 = vld [vmem:[%s4242_s1 + $0x48] sm:$0xff] (!%p271_p3)   ;;  %v3426_v4 = vld [vmem:[%s4242_s1 + $0x50] sm:$0xff] (!%p271_p3)   ;;  %vm809_vm0 = vcmask (!%p271_p3), 1042432   ;;  %vm810_vm1 = vcmask (!%p271_p3), 1046532  }
   0x7   : > { %274 = sbr.rel (%p271_p3) target bundleno = 399 (0x18f), region = 44  ;;  %v3423_v1 = vld [vmem:[%s4242_s1 + $0x140] sm:$0xff] (!%p271_p3)   ;;  %3098 = vmatprep.subr.bf16.mxu1 (!%p271_p3), %v3422_v0  ;;  %v3425_v3 = vld [vmem:[%s4242_s1 + $0x148] sm:$0xff] (!%p271_p3)   ;;  %v3427_v5 = vld [vmem:[%s4242_s1 + $0x150] sm:$0xff] (!%p271_p3)   ;;  %vm387_vm2 = vsmask.f32 (!%p271_p3), 3328 }
   0x8   : > { %3218 = vmatprep.subr.bf16.mxu0 (!%p271_p3), %v3423_v1  ;;  %3099 = vmatpush3.bf16.msra.mxu1 (!%p271_p3), %v3422_v0  ;;  %v3428_v6 = vld [vmem:[%s4242_s1 + $0x58] sm:$0xff] (!%p271_p3)   ;;  %v3430_v8 = vld [vmem:[%s4242_s1 + $0x60] sm:$0xff] (!%p271_p3)   ;;  %v3432_v10 = vld [vmem:[%s4242_s1 + $0x68] sm:$0xff] (!%p271_p3)   ;;  %vm388_vm3 = vsmask.f32 (!%p271_p3), 7440  ;;  %vm2366_vm6 = vcmask (!%p271_p3), 1041408  }
   0x9   : > { %3219 = vmatpush3.bf16.msra.mxu0 (!%p271_p3), %v3423_v1  ;;  %3100 = vmatprep.subr.bf16.mxu1 (!%p271_p3), %v3424_v2  ;;  %v3429_v7 = vld [vmem:[%s4242_s1 + $0x158] sm:$0xff] (!%p271_p3)   ;;  %v3431_v9 = vld [vmem:[%s4242_s1 + $0x160] sm:$0xff] (!%p271_p3)   ;;  %v3433_v14 = vld [vmem:[%s4242_s1 + $0x168] sm:$0xff] (!%p271_p3)   ;;  %vm2353_vm7 = vcmask (!%p271_p3), 31744  }
   0xa   : > { %3220 = vmatprep.subr.bf16.mxu0 (!%p271_p3), %v3425_v3  ;;  %v3434_v22 = vld [vmem:[%s4242_s1 + $0x70] sm:$0xff] (!%p271_p3)   ;;  %vm3664_vm4 = vmor (!%p271_p3), %vm809_vm0, %vm810_vm1  ;;  %v3436_v41 = vld [vmem:[%s4242_s1 + $0x78] sm:$0xff] (!%p271_p3)  }
   0xb   : > { %v3435_v26 = vld [vmem:[%s4242_s1 + $0x170] sm:$0xff] (!%p271_p3)   ;;  %vm3672_vm5 = vmor (!%p271_p3), %vm387_vm2, %vm388_vm3  ;;  %v3437_v44 = vld [vmem:[%s4242_s1 + $0x178] sm:$0xff] (!%p271_p3)  }
   0xc   : > { %3101 = vmatpush3.bf16.msra.mxu1 (!%p271_p3), %v3424_v2  ;;  %v3438_v61 = vld [vmem:[%s4242_s1] sm:$0xff] (!%p271_p3)   ;;  %v3509_v36 = vld [vmem:[%s4242_s1 + $0x138] sm:$0xff] (!%p271_p3)  }
   0xd   : > { %3221 = vmatpush3.bf16.msra.mxu0 (!%p271_p3), %v3425_v3  ;;  %3102 = vmatprep.subr.bf16.mxu1 (!%p271_p3), %v3426_v4  ;;  %v3439_v2 = vld [vmem:[%s4242_s1 + $0x180] sm:$0xff] (!%p271_p3)  }
   0xe   : > { %s4257_s21 = smov (!%p322_p4, %s3525_s21), 1  ;;  %3222 = vmatprep.subr.bf16.mxu0 %v3427_v5 }
   0xf   : > { %s3397_s17 = smul.u32 80, %s4257_s21  ;;  %s2983_s30 = sshll.u32 %s4257_s21, 5 }
  0x10   : > { %3103 = vmatpush3.bf16.msra.mxu1 %v3426_v4  ;;  %s4093_s13 = scalar_lea.vmem %s4244_s3, %s2983_s30  ;;  %s2984_s29 = sshll.u32 %s4257_s21, 6 }
  0x11   : > { %3223 = vmatpush3.bf16.msra.mxu0 %v3427_v5  ;;  %3104 = vmatprep.subr.bf16.mxu1 %v3428_v6  ;;  %s3624_s28 = scalar_lea.vmem %s4241_s0, %s3397_s17  ;;  %s4222_s8 = scalar_lea.vmem %s4247_s6, %s2984_s29 }
  0x12   : > { %3224 = vmatprep.subr.bf16.mxu0 %v3429_v7  ;;  %v3630_v11 = vld [vmem:[%s3624_s28] sm:$0xf]  ;;  %v3633_v12 = vld [vmem:[%s3624_s28 + $0x8] sm:$0xf]  ;;  %v3636_v13 = vld [vmem:[%s3624_s28 + $0x4] sm:$0x1] }
  0x13   : > { %v3642_v15 = vld [vmem:[%s3624_s28 + $0xc] sm:$0x1]  ;;  %v391_v16 = vshrl.u32 %v3630_v11, 16  ;;  %v394_v17 = vshll.u32 %v3630_v11, 16  ;;  %v400_v18 = vshll.u32 %v3636_v13, 16  ;;  %v405_v19 = vshrl.u32 %v3633_v12, 16 }
  0x14   : > { %3105 = vmatpush3.bf16.msra.mxu1 %v3428_v6  ;;  %v408_v20 = vshll.u32 %v3633_v12, 16  ;;  %v414_v21 = vshll.u32 %v3642_v15, 16  ;;  %v3657_v28 = vld [vmem:[%s3624_s28 + $0xc] sm:$0x1]  ;;  %v3660_v29 = vld [vmem:[%s3624_s28 + $0x14] sm:$0x1] }
  0x15   : > { %3225 = vmatpush3.bf16.msra.mxu0 %v3429_v7  ;;  %3106 = vmatprep.subr.bf16.mxu1 %v3430_v8  ;;  %v393_v23 = vrot.slane %v391_v16, 4  ;;  %v396_v24 = vrot.slane %v394_v17, 5  ;;  %v407_v25 = vrot.slane %v405_v19, 4  ;;  %v402_v31 = vrot.slane %v400_v18, 5  ;;  %v2803_v34 = vld [vmem:[%s3624_s28 + $0x8] sm:$0xe] }
  0x16   : > { %3226 = vmatprep.subr.bf16.mxu0 %v3431_v9  ;;  %v410_v27 = vrot.slane %v408_v20, 5  ;;  %v416_v32 = vrot.slane %v414_v21, 5  ;;  %v2804_v35 = vld [vmem:[%s3624_s28 + $0x10] sm:$0xe]  ;;  %v2811_v38 = vrot.slane %v2803_v34, 9  ;;  %v1477_v39 = vrot.slane %v3657_v28, 5 }
  0x17   : > { %v397_v30 = vor.u32 %v396_v24, %v393_v23  ;;  %v2812_v40 = vrot.slane %v2804_v35, 9  ;;  %v1481_v43 = vrot.slane %v3660_v29, 5  ;;  %v3687_v47 = vld [vmem:[%s3624_s28 + $0x10] sm:$0xf]  ;;  %v3690_v48 = vld [vmem:[%s3624_s28 + $0x18] sm:$0xf] }
  0x18   : > { %3107 = vmatpush3.bf16.msra.mxu1 %v3430_v8  ;;  %v411_v37 = vor.u32 %v410_v27, %v407_v25  ;;  %v1478_v46 = vsel %vm3664_vm4, %v2811_v38, %v1477_v39  ;;  %v3697_v51 = vld [vmem:[%s3624_s28 + $0x14] sm:$0x1]  ;;  %v3700_v52 = vld [vmem:[%s3624_s28 + $0x1c] sm:$0x1]  ;;  %v419_v53 = vshrl.u32 %v3687_v47, 16  ;;  %v422_v54 = vshll.u32 %v3687_v47, 16 }
  0x19   : > { %3227 = vmatpush3.bf16.msra.mxu0 %v3431_v9  ;;  %3108 = vmatprep.subr.bf16.mxu1 %v3432_v10  ;;  %v398_v42 = vrot.slane %v397_v30, 4  ;;  %v1482_v50 = vsel %vm3664_vm4, %v2812_v40, %v1481_v43  ;;  %v428_v57 = vshll.u32 %v3697_v51, 16  ;;  %v433_v58 = vshrl.u32 %v3690_v48, 16  ;;  %v3709_v59 = vld [vmem:[%s3624_s28 + $0x1c] sm:$0x1]  ;;  %v3441_v24 = vld [vmem:[%s4242_s1 + $0x188] sm:$0xff]  }
  0x1a   : > { %3228 = vmatprep.subr.bf16.mxu0 %v3433_v14  ;;  %v412_v45 = vrot.slane %v411_v37, 4  ;;  %v2835_v56 = vcombine.low %v1478_v46, %v1482_v50  ;;  %v421_v62 = vrot.slane %v419_v53, 4  ;;  %v424_v63 = vrot.slane %v422_v54, 5  ;;  %v2805_v1 = vld [vmem:[%s3624_s28 + $0x18] sm:$0xe]  ;;  %v3443_v34 = vld [vmem:[%s4242_s1 + $0x190] sm:$0xff]  }
  0x1b   : > { %v403_v49 = vsel %vm3672_vm5, %v398_v42, %v402_v31  ;;  %v436_v0 = vshll.u32 %v3690_v48, 16  ;;  %v435_v3 = vrot.slane %v433_v58, 4  ;;  %v442_v4 = vshll.u32 %v3700_v52, 16  ;;  %v2806_v5 = vld [vmem:[%s3624_s28 + $0x20] sm:$0xe]  ;;  %v3440_v31 = vld [vmem:[%s4242_s1 + $0x8] sm:$0xff]  }
  0x1c   : > { %3109 = vmatpush3.bf16.msra.mxu1 %v3432_v10  ;;  %v417_v55 = vsel %vm3672_vm5, %v412_v45, %v416_v32  ;;  %3234 = vmatprep.mubr.bf16.mxu0 %v2835_v56  ;;  %v425_v6 = vor.u32 %v424_v63, %v421_v62  ;;  %v430_v7 = vrot.slane %v428_v57, 5  ;;  %v3722_v9 = vld [vmem:[%s3624_s28 + $0x24] sm:$0x1]  ;;  %v2813_v10 = vrot.slane %v2805_v1, 9  ;;  %v3442_v32 = vld [vmem:[%s4242_s1 + $0x10] sm:$0xff]  }
  0x1d   : > { %3229 = vmatpush3.bf16.msra.mxu0 %v3433_v14  ;;  %3110 = vmatprep.subr.bf16.mxu1 %v3434_v22  ;;  %v2663_v60 = vcombine.low %v403_v49, %v417_v55  ;;  %v438_v8 = vrot.slane %v436_v0, 5  ;;  %v1485_v14 = vrot.slane %v3709_v59, 5  ;;  %v444_v18 = vrot.slane %v442_v4, 5  ;;  %v3747_v35 = vld [vmem:[%s3624_s28 + $0x20] sm:$0xf]  ;;  %v3445_v49 = vld [vmem:[%s4242_s1 + $0x198] sm:$0xff]  }
  0x1e   : > { %3230 = vmatprep.subr.bf16.mxu0 %v3435_v26  ;;  %v426_v16 = vrot.slane %v425_v6, 4  ;;  %v2814_v19 = vrot.slane %v2806_v5, 9  ;;  %v1489_v21 = vrot.slane %v3722_v9, 5  ;;  %v3750_v37 = vld [vmem:[%s3624_s28 + $0x28] sm:$0xf]  ;;  %v447_v40 = vshrl.u32 %v3747_v35, 16 }
  0x1f   : > { %3114 = vmatprep.mubr.bf16.mxu1 %v2663_v60  ;;  %v439_v17 = vor.u32 %v438_v8, %v435_v3  ;;  %v1486_v20 = vsel %vm3664_vm4, %v2813_v10, %v1485_v14  ;;  %v3753_v38 = vld [vmem:[%s3624_s28 + $0x24] sm:$0x1]  ;;  %v3756_v39 = vld [vmem:[%s3624_s28 + $0x2c] sm:$0x1]  ;;  %v461_v43 = vshrl.u32 %v3750_v37, 16  ;;  %v464_v45 = vshll.u32 %v3750_v37, 16 }
  0x20   : > { %3111 = vmatpush3.bf16.msra.mxu1 %v3434_v22  ;;  %v431_v22 = vsel %vm3672_vm5, %v426_v16, %v430_v7  ;;  %v1490_v25 = vsel %vm3664_vm4, %v2814_v19, %v1489_v21  ;;  %v456_v42 = vshll.u32 %v3753_v38, 16  ;;  %v470_v46 = vshll.u32 %v3756_v39, 16  ;;  %v3771_v55 = vld [vmem:[%s3624_s28 + $0x2c] sm:$0x1]  ;;  %v3774_v58 = vld [vmem:[%s3624_s28 + $0x34] sm:$0x1] }
  0x21   : > { %3231 = vmatpush3.bf16.msra.mxu0 %v3435_v26  ;;  %3112 = vmatprep.subr.bf16.mxu1 %v3436_v41  ;;  %v440_v23 = vrot.slane %v439_v17, 4  ;;  %v2836_v27 = vcombine.low %v1486_v20, %v1490_v25  ;;  %v449_v50 = vrot.slane %v447_v40, 4  ;;  %v463_v54 = vrot.slane %v461_v43, 4  ;;  %v2807_v60 = vld [vmem:[%s3624_s28 + $0x28] sm:$0xe]  ;;  %v3447_v6 = vld [vmem:[%s4242_s1 + $0x1a0] sm:$0xff]  }
  0x22   : > { %3232 = vmatprep.subr.bf16.mxu0 %v3437_v44  ;;  %v458_v56 = vrot.slane %v456_v42, 5  ;;  %v466_v57 = vrot.slane %v464_v45, 5  ;;  %v2808_v62 = vld [vmem:[%s3624_s28 + $0x30] sm:$0xe]  ;;  %v2815_v63 = vrot.slane %v2807_v60, 9  ;;  %v1493_v0 = vrot.slane %v3771_v55, 5 }
  0x23   : > { %v445_v26 = vsel %vm3672_vm5, %v440_v23, %v444_v18  ;;  %v1497_v1 = vrot.slane %v3774_v58, 5  ;;  %v472_v4 = vrot.slane %v470_v46, 5  ;;  %v2816_v5 = vrot.slane %v2808_v62, 9  ;;  %v3789_v10 = vld [vmem:[%s3624_s28 + $0x30] sm:$0xf] }
  0x24   : > { %3113 = vmatpush3.bf16.msra.mxu1 %v3436_v41  ;;  %v2664_v30 = vcombine.low %v431_v22, %v445_v26  ;;  %v450_v41 = vshll.u32 %v3747_v35, 16  ;;  %v467_v3 = vor.u32 %v466_v57, %v463_v54  ;;  %v1494_v8 = vsel %vm3664_vm4, %v2815_v63, %v1493_v0  ;;  %v3792_v14 = vld [vmem:[%s3624_s28 + $0x38] sm:$0xf]  ;;  %v3797_v18 = vld [vmem:[%s3624_s28 + $0x34] sm:$0x1] }
  0x25   : > { %3233 = vmatpush3.bf16.msra.mxu0 %v3437_v44  ;;  %3122 = vmatprep.subr.bf16.mxu1 %v3438_v61  ;;  %v3444_v44 = vld [vmem:[%s4242_s1 + $0x18] sm:$0xff]   ;;  %v1498_v17 = vsel %vm3664_vm4, %v2816_v5, %v1497_v1  ;;  %v475_v20 = vshrl.u32 %v3789_v10, 16  ;;  %v478_v23 = vshll.u32 %v3789_v10, 16  ;;  %v2774_v26 = vld [vmem:[%s3624_s28 + $0x44] sm:$0x1]  ;;  %v3451_v0 = vld [vmem:[%s4242_s1 + $0x1b0] sm:$0xff]  }
  0x26   : > { %3242 = vmatprep.subr.bf16.mxu0 %v3439_v2  ;;  %v452_v53 = vrot.slane %v450_v41, 5  ;;  %v468_v16 = vrot.slane %v467_v3, 4  ;;  %v3800_v19 = vld [vmem:[%s3624_s28 + $0x3c] sm:$0x1]  ;;  %v2837_v22 = vcombine.low %v1494_v8, %v1498_v17  ;;  %v2809_v40 = vld [vmem:[%s3624_s28 + $0x38] sm:$0xe] }
  0x27   : > { %3115 = vmatmul.mubr.bf16.vlgmr.msra.gmra.mrb[0].mxu1 %v2664_v30  ;;  %v3808_v25 = vld [vmem:[%s3624_s28 + $0x3c] sm:$0x1]  ;;  %v3449_v41 = vld [vmem:[%s4242_s1 + $0x1a8] sm:$0xff]   ;;  %v480_v43 = vrot.slane %v478_v23, 5  ;;  %v498_v46 = vshll.u32 %v3800_v19, 16  ;;  %v2817_v54 = vrot.slane %v2809_v40, 9 }
  0x28   : > { %3235 = vmatmul.mubr.bf16.vlgmr.msra.gmra.mrb[0].mxu0 %v2836_v27  ;;  %3123 = vmatpush3.bf16.msra.mxu1 %v3438_v61  ;;  %v453_v61 = vor.u32 %v452_v53, %v449_v50  ;;  %v3448_v27 = vld [vmem:[%s4242_s1 + $0x28] sm:$0xff]   ;;  %v473_v30 = vsel %vm3672_vm5, %v468_v16, %v472_v4  ;;  %v3450_v4 = vld [vmem:[%s4242_s1 + $0x30] sm:$0xff]   ;;  %v3452_v16 = vld [vmem:[%s4242_s1 + $0x38] sm:$0xff]   ;;  %v814_v23 = vrot.slane %v3636_v13, 5 }
  0x29   : > { %3243 = vmatpush3.bf16.msra.mxu0 %v3439_v2  ;;  %3124 = vmatprep.subr.bf16.mxu1 %v3440_v31  ;;  %v3446_v2 = vld [vmem:[%s4242_s1 + $0x20] sm:$0xff]   ;;  %v500_v57 = vrot.slane %v498_v46, 5  ;;  %v3453_v17 = vld [vmem:[%s4242_s1 + $0x1b8] sm:$0xff]   ;;  %v3460_v13 = vld [vmem:[%s4242_s1 + $0x88] sm:$0xff]   ;;  %v2678_v46 = vcombine.low %v3789_v10, %v3792_v14 }
  0x2a   : > { %3244 = vmatprep.subr.bf16.mxu0 %v3441_v24  ;;  %v454_v7 = vrot.slane %v453_v61, 4  ;;  %3238 = vmatprep.mubr.bf16.mxu0 %v2837_v22  ;;  %v1505_v61 = vrot.slane %v2774_v26, 5  ;;  %v3457_v22 = vld [vmem:[%s4242_s1 + $0x1c0] sm:$0xff]   ;;  %v2676_v26 = vcombine.low %v3687_v47, %v3690_v48  ;;  %v3472_v47 = vld [vmem:[%s3624_s28 + $0x30] ss:$8 sps:$4 sm:$0xff]   ;;  %v822_v48 = vrot.slane %v3697_v51, 5 }
  0x2b   : > { %v3463_v40 = vld [vmem:[%s4242_s1 + $0x1d0] sm:$0xff]  }
  0x2c   : > { %3125 = vmatpush3.bf16.msra.mxu1 %v3440_v31  ;;  %v459_v21 = vsel %vm3672_vm5, %v454_v7, %v458_v56  ;;  %v477_v31 = vrot.slane %v475_v20, 4  ;;  %v1501_v56 = vrot.slane %v3808_v25, 5  ;;  %v3456_v7 = vld [vmem:[%s3624_s28 + $0x10] ss:$8 sps:$4 sm:$0xff]   ;;  %v2675_v20 = vcombine.low %v3630_v11, %v3633_v12  ;;  %v3455_v11 = vld [vmem:[%s4242_s1 + $0x80] sm:$0xff]  }
  0x2d   : > { %3245 = vmatpush3.bf16.msra.mxu0 %v3441_v24  ;;  %3126 = vmatprep.subr.bf16.mxu1 %v3442_v32  ;;  %v484_v24 = vshll.u32 %v3797_v18, 16  ;;  %v2665_v42 = vcombine.low %v459_v21, %v473_v30  ;;  %v3459_v12 = vld [vmem:[%s3624_s28 + $0x20] ss:$8 sps:$4 sm:$0xff]  }
  0x2e   : > { %3246 = vmatprep.subr.bf16.mxu0 %v3443_v34  ;;  %v1502_v63 = vsel %vm3664_vm4, %v2817_v54, %v1501_v56  ;;  %v3461_v30 = vld [vmem:[%s4242_s1 + $0x1c8] sm:$0xff]   ;;  %v2883_v54 = vld [vmem:[%s3624_s28 + $0x10] sm:$0xf]  ;;  %v3893_v56 = vld [vmem:[%s3624_s28 + $0x14] sm:$0x1] }
  0x2f   : > { %v486_v45 = vrot.slane %v484_v24, 5  ;;  %3118 = vmatprep.mubr.bf16.mxu1 %v2665_v42  ;;  %v818_v24 = vrot.slane %v3642_v15, 5  ;;  %v2677_v15 = vcombine.low %v3747_v35, %v3750_v37  ;;  %v1237_v35 = vshll.u32 %v3722_v9, 16  ;;  %v3462_v37 = vld [vmem:[%s4242_s1 + $0x90] sm:$0xff]   ;;  %v785_v42 = vld [vmem:[%s3624_s28] sm:$0xe] }
  0x30   : > { %3127 = vmatpush3.bf16.msra.mxu1 %v3442_v32  ;;  %v489_v32 = vshrl.u32 %v3792_v14, 16  ;;  %v3488_v9 = vld [vmem:[%s4242_s1 + $0xe8] sm:$0xff]  }
  0x31   : > { %3247 = vmatpush3.bf16.msra.mxu0 %v3443_v34  ;;  %3128 = vmatprep.subr.bf16.mxu1 %v3444_v44  ;;  %v492_v34 = vshll.u32 %v3792_v14, 16  ;;  %v2885_v14 = vld [vmem:[%s3624_s28 + $0x18] sm:$0xf] }
  0x32   : > { %3248 = vmatprep.subr.bf16.mxu0 %v3445_v49  ;;  %v491_v50 = vrot.slane %v489_v32, 4  ;;  %v826_v32 = vrot.slane %v3700_v52, 5 }
  0x33   : > { %v494_v53 = vrot.slane %v492_v34, 5  ;;  %v1223_v34 = vshll.u32 %v3709_v59, 16  ;;  %v3489_v59 = vld [vmem:[%s4242_s1 + $0x228] sm:$0xff]  }
  0x34   : > { %3129 = vmatpush3.bf16.msra.mxu1 %v3444_v44  ;;  %v481_v44 = vor.u32 %v480_v43, %v477_v31  ;;  %v1209_v31 = vshll.u32 %v3660_v29, 16  ;;  %v786_v43 = vld [vmem:[%s3624_s28 + $0x8] sm:$0xe]  ;;  %v1251_v29 = vshll.u32 %v3771_v55, 16  ;;  %v2931_v55 = vld [vmem:[%s3624_s28 + $0x30] sm:$0xe] }
  0x35   : > { %3249 = vmatpush3.bf16.msra.mxu0 %v3445_v49  ;;  %v2810_v49 = vld [vmem:[%s3624_s28 + $0x40] sm:$0xe]  ;;  %3130 = vmatprep.subr.bf16.mxu1 %v3446_v2  ;;  %v495_v62 = vor.u32 %v494_v53, %v491_v50  ;;  %v2688_v50 = vrot.slane %v786_v43, 9  ;;  %v3465_v53 = vld [vmem:[%s4242_s1 + $0x1d8] sm:$0xff]   ;;  %v834_v43 = vrot.slane %v3756_v39, 5  ;;  %v3482_v39 = vld [vmem:[%s4242_s1 + $0xd0] sm:$0xff]  }
  0x36   : > { %3250 = vmatprep.subr.bf16.mxu0 %v3447_v6  ;;  %v2818_v60 = vrot.slane %v2810_v49, 9  ;;  %v482_v1 = vrot.slane %v481_v44, 4  ;;  %v2687_v49 = vrot.slane %v785_v42, 9  ;;  %v830_v44 = vrot.slane %v3753_v38, 5 }
  0x37   : > { %v496_v5 = vrot.slane %v495_v62, 4  ;;  %v819_v10 = vsel %vm3664_vm4, %v2688_v50, %v818_v24  ;;  %v1852_v62 = vshll.u32 %v2883_v54, 16 }
  0x38   : > { %3131 = vmatpush3.bf16.msra.mxu1 %v3446_v2  ;;  %v1506_v3 = vsel %vm3664_vm4, %v2818_v60, %v1505_v61  ;;  %v487_v2 = vsel %vm3672_vm5, %v482_v1, %v486_v45  ;;  %v3464_v45 = vld [vmem:[%s4242_s1 + $0x98] sm:$0xff]   ;;  %v1849_v61 = vshrl.u32 %v2883_v54, 16  ;;  %v1863_v1 = vshrl.u32 %v2885_v14, 16 }
  0x39   : > { %3251 = vmatpush3.bf16.msra.mxu0 %v3447_v6  ;;  %3132 = vmatprep.subr.bf16.mxu1 %v3448_v27  ;;  %v2838_v6 = vcombine.low %v1502_v63, %v1506_v3  ;;  %v501_v8 = vsel %vm3672_vm5, %v496_v5, %v500_v57  ;;  %v815_v57 = vsel %vm3664_vm4, %v2687_v49, %v814_v23  ;;  %v3902_v60 = vld [vmem:[%s3624_s28 + $0x1c] sm:$0x1]  ;;  %v1866_v3 = vshll.u32 %v2885_v14, 16  ;;  %v2887_v23 = vld [vmem:[%s3624_s28 + $0x20] sm:$0xf] }
  0x3a   : > { %3252 = vmatprep.subr.bf16.mxu0 %v3449_v41  ;;  %v2666_v21 = vcombine.low %v487_v2, %v501_v8  ;;  %v2711_v63 = vcombine.low %v815_v57, %v819_v10  ;;  %v1851_v5 = vrot.slane %v1849_v61, 4  ;;  %v3467_v2 = vld [vmem:[%s4242_s1 + $0x1e0] sm:$0xff]   ;;  %v1880_v42 = vshll.u32 %v2887_v23, 16 }
  0x3b   : > { %3239 = vmatmul.mubr.bf16.gmra.mrb[4].mxu0 %v2838_v6  ;;  %v1854_v6 = vrot.slane %v1852_v62, 5 }
  0x3c   : > { %3133 = vmatpush3.bf16.msra.mxu1 %v3448_v27  ;;  %3258 = vmatprep.mubr.bf16.mxu0 %v3456_v7  ;;  %v1195_v27 = vshll.u32 %v3657_v28, 16  ;;  %v1872_v7 = vshll.u32 %v3902_v60, 16  ;;  %v1882_v54 = vrot.slane %v1880_v42, 5  ;;  %v4063_v28 = vrot.slane %v1209_v31, 5  ;;  %v2930_v31 = vld [vmem:[%s3624_s28 + $0x28] sm:$0xe] }
  0x3d   : > { %3253 = vmatpush3.bf16.msra.mxu0 %v3449_v41  ;;  %3134 = vmatprep.subr.bf16.mxu1 %v3450_v4  ;;  %v3475_v41 = vld [vmem:[%s3624_s28 + $0x40] ss:$8 sps:$4 sm:$0xff]  }
  0x3e   : > { %3254 = vmatprep.subr.bf16.mxu0 %v3451_v0  ;;  %3119 = vmatmul.mubr.bf16.gmra.mrb[4].mxu1 %v2666_v21  ;;  %v1855_v21 = vor.u32 %v1854_v6, %v1851_v5 }
  0x3f   : > { %3138 = vmatprep.mubr.bf16.mxu1 %v2675_v20  ;;  %v787_v20 = vld [vmem:[%s3624_s28 + $0x10] sm:$0xe] }
  0x40   : > { %3135 = vmatpush3.bf16.msra.mxu1 %v3450_v4  ;;  %v3466_v4 = vld [vmem:[%s4242_s1 + $0xa0] sm:$0xff]  }
  0x41   : > { %3255 = vmatpush3.bf16.msra.mxu0 %v3451_v0  ;;  %3136 = vmatprep.subr.bf16.mxu1 %v3452_v16  ;;  %v1858_v0 = vshll.u32 %v3893_v56, 16 }
  0x42   : > { %3256 = vmatprep.subr.bf16.mxu0 %v3453_v17 }
  0x43   : > { %v1860_v8 = vrot.slane %v1858_v0, 5 }
  0x44   : > { %3137 = vmatpush3.bf16.msra.mxu1 %v3452_v16  ;;  %v1865_v16 = vrot.slane %v1863_v1, 4  ;;  %v3471_v1 = vld [vmem:[%s4242_s1 + $0xb0] sm:$0xff]  }
  0x45   : > { %3257 = vmatpush3.bf16.msra.mxu0 %v3453_v17  ;;  %3146 = vmatprep.subr.bf16.mxu1 %v3455_v11  ;;  %v1868_v17 = vrot.slane %v1866_v3, 5 }
  0x46   : > { %3266 = vmatprep.subr.bf16.mxu0 %v3457_v22 }
  0x47   : > { %3139 = vmatmul.mubr.bf16.vlgmr.msra.gmra.mrb[0].mxu1 %v2676_v26  ;;  %v1869_v24 = vor.u32 %v1868_v17, %v1865_v16  ;;  %v838_v16 = vrot.slane %v3797_v18, 5  ;;  %v3479_v17 = vld [vmem:[%s4242_s1 + $0x200] sm:$0xff]  }
  0x48   : > { %3259 = vmatmul.mubr.bf16.vlgmr.msra.gmra.mrb[0].mxu0 %v3459_v12  ;;  %3147 = vmatpush3.bf16.msra.mxu1 %v3455_v11  ;;  %v788_v11 = vld [vmem:[%s3624_s28 + $0x18] sm:$0xe]  ;;  %v2689_v12 = vrot.slane %v787_v20, 9  ;;  %v2891_v20 = vld [vmem:[%s3624_s28 + $0x30] sm:$0xf] }
  0x49   : > { %3267 = vmatpush3.bf16.msra.mxu0 %v3457_v22  ;;  %3148 = vmatprep.subr.bf16.mxu1 %v3460_v13  ;;  %v1874_v22 = vrot.slane %v1872_v7, 5  ;;  %v2690_v26 = vrot.slane %v788_v11, 9  ;;  %v1870_v49 = vrot.slane %v1869_v24, 4  ;;  %v3478_v11 = vld [vmem:[%s4242_s1 + $0xc0] sm:$0xff]   ;;  %v2893_v24 = vld [vmem:[%s3624_s28 + $0x38] sm:$0xf] }
  0x4a   : > { %3268 = vmatprep.subr.bf16.mxu0 %v3461_v30  ;;  %3142 = vmatprep.mubr.bf16.mxu1 %v2677_v15  ;;  %v1877_v15 = vshrl.u32 %v2887_v23, 16  ;;  %v1922_v42 = vshll.u32 %v2893_v24, 16 }
  0x4b   : > { %3262 = vmatprep.mubr.bf16.mxu0 %v3472_v47  ;;  %v3468_v47 = vld [vmem:[%s4242_s1 + $0xa8] sm:$0xff]   ;;  %v3939_v51 = vsel %vm3664_vm4, %v2690_v26, %v826_v32  ;;  %v1875_v10 = vsel %vm3672_vm5, %v1870_v49, %v1874_v22  ;;  %v842_v22 = vrot.slane %v3800_v19, 5  ;;  %v3979_v26 = vld [vmem:[%s3624_s28 + $0x3c] sm:$0x1]  ;;  %v789_v49 = vld [vmem:[%s3624_s28 + $0x20] sm:$0xe] }
  0x4c   : > { %3149 = vmatpush3.bf16.msra.mxu1 %v3460_v13  ;;  %v2889_v13 = vld [vmem:[%s3624_s28 + $0x28] sm:$0xf] }
  0x4d   : > { %3269 = vmatpush3.bf16.msra.mxu0 %v3461_v30  ;;  %3150 = vmatprep.subr.bf16.mxu1 %v3462_v37  ;;  %v3916_v30 = vld [vmem:[%s3624_s28 + $0x24] sm:$0x1]  ;;  %v1891_v50 = vshrl.u32 %v2889_v13, 16  ;;  %v1894_v14 = vshll.u32 %v2889_v13, 16  ;;  %v1905_v13 = vshrl.u32 %v2891_v20, 16 }
  0x4e   : > { %3270 = vmatprep.subr.bf16.mxu0 %v3463_v40  ;;  %v1886_v57 = vshll.u32 %v3916_v30, 16 }
  0x4f   : > { %3143 = vmatmul.mubr.bf16.gmra.mrb[4].mxu1 %v2678_v46  ;;  %v3469_v46 = vld [vmem:[%s4242_s1 + $0x1e8] sm:$0xff]   ;;  %v1893_v52 = vrot.slane %v1891_v50, 4  ;;  %v1896_v0 = vrot.slane %v1894_v14, 5 }
  0x50   : > { %3263 = vmatmul.mubr.bf16.gmra.mrb[4].mxu0 %v3475_v41  ;;  %3151 = vmatpush3.bf16.msra.mxu1 %v3462_v37  ;;  %v3926_v37 = vsel %vm3664_vm4, %v2689_v12, %v822_v48  ;;  %v3929_v41 = vld [vmem:[%s3624_s28 + $0x2c] sm:$0x1]  ;;  %v1879_v48 = vrot.slane %v1877_v15, 4  ;;  %v1888_v3 = vrot.slane %v1886_v57, 5  ;;  %v1908_v15 = vshll.u32 %v2891_v20, 16 }
  0x51   : > { %3271 = vmatpush3.bf16.msra.mxu0 %v3463_v40  ;;  %3152 = vmatprep.subr.bf16.mxu1 %v3464_v45  ;;  %v1856_v40 = vrot.slane %v1855_v21, 4  ;;  %v1900_v32 = vshll.u32 %v3929_v41, 16  ;;  %v1897_v5 = vor.u32 %v1896_v0, %v1893_v52  ;;  %v3967_v21 = vld [vmem:[%s3624_s28 + $0x34] sm:$0x1]  ;;  %v2140_v57 = vrot.slane %v3893_v56, 5  ;;  %v3481_v52 = vld [vmem:[%s4242_s1 + $0x208] sm:$0xff]  }
  0x52   : > { %3272 = vmatprep.subr.bf16.mxu0 %v3465_v53  ;;  %3162 = vmatprep.mubr.bf16.mxu1 %v2711_v63  ;;  %v1883_v62 = vor.u32 %v1882_v54, %v1879_v48  ;;  %v3473_v63 = vld [vmem:[%s4242_s1 + $0x1f0] sm:$0xff]   ;;  %v1907_v48 = vrot.slane %v1905_v13, 4  ;;  %v1910_v50 = vrot.slane %v1908_v15, 5  ;;  %v2691_v54 = vrot.slane %v789_v49, 9  ;;  %v792_v49 = vld [vmem:[%s3624_s28 + $0x38] sm:$0xe] }
  0x53   : > { %v1902_v7 = vrot.slane %v1900_v32, 5 }
  0x54   : > { %3153 = vmatpush3.bf16.msra.mxu1 %v3464_v45  ;;  %v2712_v45 = vcombine.low %v3926_v37, %v3939_v51  ;;  %v1884_v6 = vrot.slane %v1883_v62, 4  ;;  %v1911_v62 = vor.u32 %v1910_v50, %v1907_v48  ;;  %v831_v0 = vsel %vm3664_vm4, %v2691_v54, %v830_v44  ;;  %v3483_v37 = vld [vmem:[%s4242_s1 + $0x210] sm:$0xff]   ;;  %v3485_v54 = vld [vmem:[%s4242_s1 + $0x218] sm:$0xff]  }
  0x55   : > { %3273 = vmatpush3.bf16.msra.mxu0 %v3465_v53  ;;  %3154 = vmatprep.subr.bf16.mxu1 %v3466_v4  ;;  %v1861_v53 = vsel %vm3672_vm5, %v1856_v40, %v1860_v8  ;;  %v3476_v8 = vld [vmem:[%s4242_s1 + $0xb8] sm:$0xff]   ;;  %v1919_v40 = vshrl.u32 %v2893_v24, 16 }
  0x56   : > { %3274 = vmatprep.subr.bf16.mxu0 %v3467_v2  ;;  %v2915_v61 = vcombine.low %v1861_v53, %v1875_v10  ;;  %v1889_v12 = vsel %vm3672_vm5, %v1884_v6, %v1888_v3  ;;  %v790_v53 = vld [vmem:[%s3624_s28 + $0x28] sm:$0xe]  ;;  %v2895_v3 = vld [vmem:[%s3624_s28 + $0x40] sm:$0xf]  ;;  %v3995_v6 = vld [vmem:[%s3624_s28 + $0x44] sm:$0x1] }
  0x57   : > { %v1921_v32 = vrot.slane %v1919_v40, 4  ;;  %v1912_v20 = vrot.slane %v1911_v62, 4  ;;  %v1933_v44 = vshrl.u32 %v2895_v3, 16  ;;  %v1942_v24 = vshll.u32 %v3995_v6, 16 }
  0x58   : > { %3155 = vmatpush3.bf16.msra.mxu1 %v3466_v4  ;;  %3282 = vmatprep.mubr.bf16.mxu0 %v2915_v61  ;;  %v3477_v4 = vld [vmem:[%s4242_s1 + $0x1f8] sm:$0xff]   ;;  %v1924_v61 = vrot.slane %v1922_v42, 5  ;;  %v791_v42 = vld [vmem:[%s3624_s28 + $0x30] sm:$0xe] }
  0x59   : > { %3275 = vmatpush3.bf16.msra.mxu0 %v3467_v2  ;;  %3156 = vmatprep.subr.bf16.mxu1 %v3468_v47  ;;  %v1898_v2 = vrot.slane %v1897_v5, 4  ;;  %v1935_v15 = vrot.slane %v1933_v44, 4 }
  0x5a   : > { %3276 = vmatprep.subr.bf16.mxu0 %v3469_v46  ;;  %v1925_v5 = vor.u32 %v1924_v61, %v1921_v32 }
  0x5b   : > { %v1903_v23 = vsel %vm3672_vm5, %v1898_v2, %v1902_v7  ;;  %v2897_v7 = vld [vmem:[%s3624_s28 + $0x48] sm:$0xf]  ;;  %v3999_v2 = vld [vmem:[%s3624_s28 + $0x4c] sm:$0x1] }
  0x5c   : > { %3157 = vmatpush3.bf16.msra.mxu1 %v3468_v47  ;;  %v1914_v47 = vshll.u32 %v3967_v21, 16  ;;  %v2916_v10 = vcombine.low %v1889_v12, %v1903_v23  ;;  %v1926_v12 = vrot.slane %v1925_v5, 4  ;;  %v1947_v13 = vshrl.u32 %v2897_v7, 16  ;;  %v3484_v5 = vld [vmem:[%s4242_s1 + $0xd8] sm:$0xff]  }
  0x5d   : > { %3277 = vmatpush3.bf16.msra.mxu0 %v3469_v46  ;;  %3158 = vmatprep.subr.bf16.mxu1 %v3471_v1  ;;  %v1928_v46 = vshll.u32 %v3979_v26, 16  ;;  %v1950_v40 = vshll.u32 %v2897_v7, 16 }
  0x5e   : > { %3278 = vmatprep.subr.bf16.mxu0 %v3473_v63  ;;  %v1916_v14 = vrot.slane %v1914_v47, 5 }
  0x60   : > { %3159 = vmatpush3.bf16.msra.mxu1 %v3471_v1  ;;  %v2692_v1 = vrot.slane %v790_v53, 9  ;;  %v2693_v53 = vrot.slane %v791_v42, 9 }
  0x61   : > { %3279 = vmatpush3.bf16.msra.mxu0 %v3473_v63  ;;  %3160 = vmatprep.subr.bf16.mxu1 %v3476_v8  ;;  %v1930_v63 = vrot.slane %v1928_v46, 5  ;;  %v1956_v46 = vshll.u32 %v3999_v2, 16 }
  0x62   : > { %3280 = vmatprep.subr.bf16.mxu0 %v3477_v4  ;;  %v835_v38 = vsel %vm3664_vm4, %v2692_v1, %v834_v43  ;;  %v1917_v43 = vsel %vm3672_vm5, %v1912_v20, %v1916_v14  ;;  %v2144_v14 = vrot.slane %v3902_v60, 5  ;;  %v2928_v1 = vld [vmem:[%s3624_s28 + $0x18] sm:$0xe]  ;;  %v4053_v20 = vrot.slane %v1195_v27, 5 }
  0x63   : > { %v2713_v23 = vcombine.low %v831_v0, %v835_v38  ;;  %v1931_v51 = vsel %vm3672_vm5, %v1926_v12, %v1930_v63  ;;  %v1958_v62 = vrot.slane %v1956_v46, 5  ;;  %v839_v63 = vsel %vm3664_vm4, %v2693_v53, %v838_v16  ;;  %v2927_v0 = vld [vmem:[%s3624_s28 + $0x10] sm:$0xe]  ;;  %v3487_v38 = vld [vmem:[%s4242_s1 + $0x220] sm:$0xff]   ;;  %v3493_v46 = vld [vmem:[%s4242_s1 + $0x238] sm:$0xff]  }
  0x64   : > { %3161 = vmatpush3.bf16.msra.mxu1 %v3476_v8  ;;  %v1936_v8 = vshll.u32 %v2895_v3, 16  ;;  %v2917_v48 = vcombine.low %v1917_v43, %v1931_v51  ;;  %v2936_v3 = vrot.slane %v2928_v1, 9  ;;  %v4067_v27 = vrot.slane %v1223_v34, 5  ;;  %v2761_v1 = vld [vmem:[%s3624_s28 + $0x10] sm:$0xf] }
  0x65   : > { %3281 = vmatpush3.bf16.msra.mxu0 %v3477_v4  ;;  %3170 = vmatprep.subr.bf16.mxu1 %v3478_v11  ;;  %v3480_v4 = vld [vmem:[%s4242_s1 + $0xc8] sm:$0xff]   ;;  %v4071_v12 = vrot.slane %v1237_v35, 5  ;;  %v2148_v35 = vrot.slane %v3916_v30, 5  ;;  %v2938_v43 = vrot.slane %v2930_v31, 9  ;;  %v3491_v30 = vld [vmem:[%s4242_s1 + $0x230] sm:$0xff]   ;;  %v2168_v51 = vrot.slane %v3999_v2, 5 }
  0x66   : > { %3290 = vmatprep.subr.bf16.mxu0 %v3479_v17  ;;  %v1938_v47 = vrot.slane %v1936_v8, 5  ;;  %v2929_v8 = vld [vmem:[%s3624_s28 + $0x20] sm:$0xe]  ;;  %v2769_v31 = vld [vmem:[%s3624_s28 + $0x30] sm:$0xf] }
  0x67   : > { %3163 = vmatmul.mubr.bf16.vlgmr.msra.gmra.mrb[0].mxu1 %v2712_v45  ;;  %v1944_v45 = vrot.slane %v1942_v24, 5  ;;  %v2937_v34 = vrot.slane %v2929_v8, 9  ;;  %v2152_v24 = vrot.slane %v3929_v41, 5  ;;  %v2934_v41 = vld [vmem:[%s3624_s28 + $0x48] sm:$0xe] }
  0x68   : > { %3283 = vmatmul.mubr.bf16.vlgmr.msra.gmra.mrb[0].mxu0 %v2916_v10  ;;  %3171 = vmatpush3.bf16.msra.mxu1 %v3478_v11  ;;  %v1939_v50 = vor.u32 %v1938_v47, %v1935_v15  ;;  %v1952_v11 = vrot.slane %v1950_v40, 5  ;;  %v2694_v10 = vrot.slane %v792_v49, 9  ;;  %v2160_v15 = vrot.slane %v3979_v26, 5  ;;  %v2933_v47 = vld [vmem:[%s3624_s28 + $0x40] sm:$0xe] }
  0x69   : > { %3291 = vmatpush3.bf16.msra.mxu0 %v3479_v17  ;;  %v1949_v17 = vrot.slane %v1947_v13, 4  ;;  %3172 = vmatprep.subr.bf16.mxu1 %v3480_v4  ;;  %v2156_v13 = vrot.slane %v3967_v21, 5  ;;  %v3490_v21 = vld [vmem:[%s4242_s1 + $0xf0] sm:$0xff]   ;;  %v2939_v40 = vrot.slane %v2931_v55, 9  ;;  %v2941_v26 = vrot.slane %v2933_v47, 9 }
  0x6a   : > { %3292 = vmatprep.subr.bf16.mxu0 %v3481_v52  ;;  %3166 = vmatprep.mubr.bf16.mxu1 %v2713_v23  ;;  %v1940_v32 = vrot.slane %v1939_v50, 4  ;;  %v843_v60 = vsel %vm3664_vm4, %v2694_v10, %v842_v22  ;;  %v2145_v22 = vsel %vm3664_vm4, %v2936_v3, %v2144_v14  ;;  %v3486_v23 = vld [vmem:[%s4242_s1 + $0xe0] sm:$0xff]   ;;  %v4110_v49 = vrot.slane %v1251_v29, 5  ;;  %v2763_v3 = vld [vmem:[%s3624_s28 + $0x18] sm:$0xf] }
  0x6b   : > { %3286 = vmatprep.mubr.bf16.mxu0 %v2917_v48  ;;  %v1953_v61 = vor.u32 %v1952_v11, %v1949_v17  ;;  %v2714_v7 = vcombine.low %v839_v63, %v843_v60  ;;  %v1265_v17 = vshll.u32 %v3774_v58, 16  ;;  %v2153_v2 = vsel %vm3664_vm4, %v2938_v43, %v2152_v24  ;;  %v2332_v58 = vld [vmem:[%s4245_s4] sm:$0x3]  ;;  %v3492_v48 = vld [vmem:[%s4242_s1 + $0xf8] sm:$0xff]   ;;  %v2759_v63 = vld [vmem:[%s3624_s28 + $0x8] sm:$0xf] }
  0x6c   : > { %3173 = vmatpush3.bf16.msra.mxu1 %v3480_v4  ;;  %v1945_v18 = vsel %vm3672_vm5, %v1940_v32, %v1944_v45  ;;  %v3494_v4 = vld [vmem:[%s3624_s28 + $0x8] ss:$8 sps:$4 sm:$0xff]   ;;  %v2942_v45 = vrot.slane %v2934_v41, 9  ;;  %v2157_v50 = vsel %vm3664_vm4, %v2939_v40, %v2156_v13  ;;  %v1279_v14 = vshll.u32 %v3808_v25, 16  ;;  %v3495_v32 = vld [vmem:[%s4242_s1 + $0x100] sm:$0xff]  }
  0x6d   : > { %3293 = vmatpush3.bf16.msra.mxu0 %v3481_v52  ;;  %v2935_v52 = vrot.slane %v2927_v0, 9  ;;  %3174 = vmatprep.subr.bf16.mxu1 %v3482_v39  ;;  %v1954_v16 = vrot.slane %v1953_v61, 4  ;;  %v4134_v10 = vrot.slane %v1265_v17, 5  ;;  %v1186_v60 = vshrl.u32 %v2759_v63, 16  ;;  %v3504_v13 = vld [vmem:[%s3624_s28 + $0x28] ss:$8 sps:$4 sm:$0xff]  }
  0x6e   : > { %3294 = vmatprep.subr.bf16.mxu0 %v3483_v37  ;;  %v1256_v47 = vshrl.u32 %v2769_v31, 16 }
  0x6f   : > { %v2141_v19 = vsel %vm3664_vm4, %v2935_v52, %v2140_v57  ;;  %v1959_v44 = vsel %vm3672_vm5, %v1954_v16, %v1958_v62  ;;  %3167 = vmatmul.mubr.bf16.gmra.mrb[4].mxu1 %v2714_v7  ;;  %v2368_v62 = vsel %vm2366_vm6, %v2332_v58, 0  ;;  %v1189_v52 = vshll.u32 %v2759_v63, 16  ;;  %v2765_v7 = vld [vmem:[%s3624_s28 + $0x20] sm:$0xf] }
  0x70   : > { %v2959_v56 = vcombine.low %v2141_v19, %v2145_v22  ;;  %3175 = vmatpush3.bf16.msra.mxu1 %v3482_v39  ;;  %v2918_v57 = vcombine.low %v1945_v18, %v1959_v44  ;;  %3186 = vmatprep.mubr.bf16.mxu1 %v3494_v4  ;;  %v2932_v39 = vld [vmem:[%s3624_s28 + $0x38] sm:$0xe]  ;;  %v1200_v18 = vshrl.u32 %v2761_v1, 16  ;;  %v1203_v16 = vshll.u32 %v2761_v1, 16  ;;  %v3500_v1 = vld [vmem:[%s4093_s13] sm:$0xff]  }
  0x71   : > { %3295 = vmatpush3.bf16.msra.mxu0 %v3483_v37  ;;  %3176 = vmatprep.subr.bf16.mxu1 %v3484_v5  ;;  %v2940_v42 = vrot.slane %v2932_v39, 9  ;;  %v2164_v37 = vrot.slane %v3995_v6, 5  ;;  %v2149_v6 = vsel %vm3664_vm4, %v2937_v34, %v2148_v35  ;;  %v1214_v4 = vshrl.u32 %v2763_v3, 16 }
  0x72   : > { %3296 = vmatprep.subr.bf16.mxu0 %v3485_v54  ;;  %3287 = vmatmul.mubr.bf16.gmra.mrb[4].mxu0 %v2918_v57  ;;  %v2960_v61 = vcombine.low %v2149_v6, %v2153_v2  ;;  %v1217_v19 = vshll.u32 %v2763_v3, 16  ;;  %v1188_v22 = vrot.slane %v1186_v60, 4  ;;  %v1228_v44 = vshrl.u32 %v2765_v7, 16  ;;  %v2767_v57 = vld [vmem:[%s3624_s28 + $0x28] sm:$0xf] }
  0x73   : > { %3306 = vmatprep.mubr.bf16.mxu0 %v2959_v56  ;;  %v2161_v11 = vsel %vm3664_vm4, %v2940_v42, %v2160_v15  ;;  %v4128_v53 = vsel %vm3664_vm4, %v2941_v26, %v2164_v37  ;;  %v1231_v56 = vshll.u32 %v2765_v7, 16  ;;  %v1202_v8 = vrot.slane %v1200_v18, 4  ;;  %v2773_v2 = vld [vmem:[%s3624_s28 + $0x40] sm:$0xf] }
  0x74   : > { %3177 = vmatpush3.bf16.msra.mxu1 %v3484_v5  ;;  %v2961_v33 = vcombine.low %v2157_v50, %v2161_v11  ;;  %v3496_v5 = vld [vmem:[%s3624_s28 + $0x18] ss:$8 sps:$4 sm:$0xff]   ;;  %v1216_v29 = vrot.slane %v1214_v4, 4  ;;  %v1230_v35 = vrot.slane %v1228_v44, 4  ;;  %v1242_v55 = vshrl.u32 %v2767_v57, 16 }
  0x75   : > { %3297 = vmatpush3.bf16.msra.mxu0 %v3485_v54  ;;  %3178 = vmatprep.subr.bf16.mxu1 %v3486_v23  ;;  %v4132_v54 = vsel %vm3664_vm4, %v2942_v45, %v2168_v51  ;;  %v1233_v24 = vrot.slane %v1231_v56, 5  ;;  %v1245_v15 = vshll.u32 %v2767_v57, 16  ;;  %v1259_v42 = vshll.u32 %v2769_v31, 16  ;;  %v3506_v60 = vld [vmem:[%s3624_s28 + $0x38] ss:$8 sps:$4 sm:$0xff]   ;;  %v3507_v31 = vld [vmem:[%s4242_s1 + $0x130] sm:$0xff]  }
  0x76   : > { %3298 = vmatprep.subr.bf16.mxu0 %v3487_v38  ;;  %v2962_v0 = vcombine.low %v4128_v53, %v4132_v54  ;;  %v1244_v40 = vrot.slane %v1242_v55, 4  ;;  %v1258_v45 = vrot.slane %v1256_v47, 4  ;;  %v3499_v4 = vld [vmem:[%s4242_s1 + $0x118] sm:$0xff]   ;;  %v1281_v44 = vrot.slane %v1279_v14, 5  ;;  %v3501_v53 = vld [vmem:[%s4242_s1 + $0x120] sm:$0xff]   ;;  %v3502_v54 = vld [vmem:[%s4093_s13 + $0x8] sm:$0xff]  }
  0x77   : > { %v1247_v26 = vrot.slane %v1245_v15, 5  ;;  %v1261_v6 = vrot.slane %v1259_v42, 5  ;;  %v3505_v14 = vld [vmem:[%s4093_s13 + $0x10] sm:$0xff]  }
  0x78   : > { %3179 = vmatpush3.bf16.msra.mxu1 %v3486_v23  ;;  %v1205_v23 = vrot.slane %v1203_v16, 5  ;;  %v3510_v16 = vld [vmem:[%s3624_s28 + $0x44] sm:$0x1] }
  0x79   : > { %3299 = vmatpush3.bf16.msra.mxu0 %v3487_v38  ;;  %3180 = vmatprep.subr.bf16.mxu1 %v3488_v9  ;;  %v1191_v38 = vrot.slane %v1189_v52, 5  ;;  %v1248_v11 = vor.u32 %v1247_v26, %v1244_v40  ;;  %v1262_v63 = vor.u32 %v1261_v6, %v1258_v45  ;;  %v1293_v7 = vshll.u32 %v3510_v16, 16  ;;  %v2980_v40 = vld [vmem:[%s4246_s5] ss:$0 sm:$0xff] }
  0x7a   : > { %3300 = vmatprep.subr.bf16.mxu0 %v3489_v59  ;;  %v1206_v39 = vor.u32 %v1205_v23, %v1202_v8 }
  0x7b   : > { %v1192_v34 = vor.u32 %v1191_v38, %v1188_v22  ;;  %v1249_v3 = vrot.slane %v1248_v11, 4  ;;  %v1263_v18 = vrot.slane %v1262_v63, 4  ;;  %v1295_v23 = vrot.slane %v1293_v7, 5 }
  0x7c   : > { %3181 = vmatpush3.bf16.msra.mxu1 %v3488_v9  ;;  %v3497_v9 = vld [vmem:[%s4242_s1 + $0x108] sm:$0xff]   ;;  %v1207_v37 = vrot.slane %v1206_v39, 4 }
  0x7d   : > { %3301 = vmatpush3.bf16.msra.mxu0 %v3489_v59  ;;  %3182 = vmatprep.subr.bf16.mxu1 %v3490_v21  ;;  %v1219_v59 = vrot.slane %v1217_v19, 5  ;;  %v1193_v41 = vrot.slane %v1192_v34, 4  ;;  %v1268_v38 = vsel %vm3672_vm5, %v1263_v18, %v4134_v10 }
  0x7e   : > { %3302 = vmatprep.subr.bf16.mxu0 %v3491_v30  ;;  %v1212_v50 = vsel %vm3672_vm5, %v1207_v37, %v4063_v28  ;;  %v1284_v28 = vshrl.u32 %v2773_v2, 16 }
  0x7f   : > { %v1220_v43 = vor.u32 %v1219_v59, %v1216_v29  ;;  %v1198_v17 = vsel %vm3672_vm5, %v1193_v41, %v4053_v20  ;;  %v3503_v29 = vld [vmem:[%s4242_s1 + $0x128] sm:$0xff]  }
  0x80   : > { %3183 = vmatpush3.bf16.msra.mxu1 %v3490_v21  ;;  %v1234_v21 = vor.u32 %v1233_v24, %v1230_v35  ;;  %v1286_v22 = vrot.slane %v1284_v28, 4 }
  0x81   : > { %3303 = vmatpush3.bf16.msra.mxu0 %v3491_v30  ;;  %3184 = vmatprep.subr.bf16.mxu1 %v3492_v48  ;;  %v2771_v30 = vld [vmem:[%s3624_s28 + $0x38] sm:$0xf]  ;;  %v1221_v51 = vrot.slane %v1220_v43, 4 }
  0x82   : > { %3304 = vmatprep.subr.bf16.mxu0 %v3493_v46 }
  0x83   : > { %v1226_v20 = vsel %vm3672_vm5, %v1221_v51, %v4067_v27  ;;  %v1287_v27 = vshll.u32 %v2773_v2, 16 }
  0x84   : > { %3185 = vmatpush3.bf16.msra.mxu1 %v3492_v48  ;;  %v3498_v48 = vld [vmem:[%s4242_s1 + $0x110] sm:$0xff]  }
  0x85   : > { %3305 = vmatpush3.bf16.msra.mxu0 %v3493_v46  ;;  %3194 = vmatprep.subr.bf16.mxu1 %v3495_v32  ;;  %v1235_v46 = vrot.slane %v1234_v21, 4  ;;  %v1289_v56 = vrot.slane %v1287_v27, 5 }
  0x86   : > { %3396 = vmatprep.subr.msk.bf16.mxu0 %vm2366_vm6, %v2332_v58  ;;  %v1270_v58 = vshrl.u32 %v2771_v30, 16 }
  0x87   : > { %3187 = vmatmul.mubr.bf16.vlgmr.msra.gmra.mrb[0].mxu1 %v3496_v5  ;;  %v1290_v8 = vor.u32 %v1289_v56, %v1286_v22 }
  0x88   : > { %3307 = vmatmul.mubr.bf16.vlgmr.msra.gmra.mrb[0].mxu0 %v2960_v61  ;;  %3195 = vmatpush3.bf16.msra.mxu1 %v3495_v32  ;;  %v1273_v32 = vshll.u32 %v2771_v30, 16  ;;  %v2791_v61 = vcombine.low %v1198_v17, %v1212_v50  ;;  %v2979_v30 = vld [vmem:[%s4243_s2] ss:$0 sm:$0xff] }
  0x89   : > { %3310 = vmatprep.mubr.bf16.mxu0 %v2961_v33  ;;  %3315 = vmatpush3.bf16.msra.mxu0 %v2368_v62  ;;  %v1240_v62 = vsel %vm3672_vm5, %v1235_v46, %v4071_v12  ;;  %v1272_v33 = vrot.slane %v1270_v58, 4  ;;  %v1254_v12 = vsel %vm3672_vm5, %v1249_v3, %v4110_v49  ;;  %v1291_v10 = vrot.slane %v1290_v8, 4 }
  0x8a   : > { %3196 = vmatprep.subr.bf16.mxu1 %v3497_v9  ;;  %3190 = vmatprep.mubr.bf16.mxu1 %v3504_v13  ;;  %v2792_v52 = vcombine.low %v1226_v20, %v1240_v62  ;;  %v1275_v5 = vrot.slane %v1273_v32, 5  ;;  %v2793_v49 = vcombine.low %v1254_v12, %v1268_v38 }
  0x8c   : > { %3197 = vmatpush3.bf16.msra.mxu1 %v3497_v9  ;;  %v1276_v19 = vor.u32 %v1275_v5, %v1272_v33  ;;  %v3508_v9 = vld [vmem:[%s4093_s13 + $0x18] sm:$0xff]  }
  0x8d   : > { %3198 = vmatprep.subr.bf16.mxu1 %v3498_v48 }
  0x8e   : > { %v1277_v57 = vrot.slane %v1276_v19, 4 }
  0x8f   : > { %3191 = vmatmul.mubr.bf16.gmra.mrb[4].mxu1 %v3506_v60 }
  0x90   : > { %3311 = vmatmul.mubr.bf16.gmra.mrb[4].mxu0 %v2962_v0  ;;  %3199 = vmatpush3.bf16.msra.mxu1 %v3498_v48  ;;  %v1282_v25 = vsel %vm3672_vm5, %v1277_v57, %v1281_v44  ;;  %v1296_v0 = vsel %vm3672_vm5, %v1291_v10, %v1295_v23 }
  0x91   : > { %3316 = vmatprep.mubr.msk.bf16.mxu0 %vm2353_vm7, %v3500_v1  ;;  %3210 = vmatprep.mubr.bf16.mxu1 %v2791_v61  ;;  %v2794_v59 = vcombine.low %v1282_v25, %v1296_v0 }
  0x92   : > { %3200 = vmatprep.subr.bf16.mxu1 %v3499_v4 }
  0x94   : > { %3201 = vmatpush3.bf16.msra.mxu1 %v3499_v4 }
  0x95   : > { %3202 = vmatprep.subr.bf16.mxu1 %v3501_v53 }
  0x98   : > { %3317 = vmatmul.mubr.msk.bf16.vlgmr.msra.gmra.mrb[0].mxu0 %vm2353_vm7, %v3502_v54  ;;  %3203 = vmatpush3.bf16.msra.mxu1 %v3501_v53 }
  0x99   : > { %3320 = vmatprep.mubr.msk.bf16.mxu0 %vm2353_vm7, %v3505_v14  ;;  %3204 = vmatprep.subr.bf16.mxu1 %v3503_v29 }
  0x9c   : > { %3205 = vmatpush3.bf16.msra.mxu1 %v3503_v29 }
  0x9d   : > { %3206 = vmatprep.subr.bf16.mxu1 %v3507_v31 }
  0xa0   : > { %3321 = vmatmul.mubr.msk.bf16.gmra.mrb[4].mxu0 %vm2353_vm7, %v3508_v9  ;;  %3207 = vmatpush3.bf16.msra.mxu1 %v3507_v31 }
  0xa1   : > { %3208 = vmatprep.subr.bf16.mxu1 %v3509_v36 }
  0xa4   : > { %3209 = vmatpush3.bf16.msra.mxu1 %v3509_v36 }
  0xa7   : > { %3211 = vmatmul.mubr.bf16.vlgmr.msra.gmra.mrb[0].mxu1 %v2792_v52 }
  0xa8   : > { %3214 = vmatprep.mubr.bf16.mxu1 %v2793_v49 }
  0xaf   : > { %3215 = vmatmul.mubr.bf16.gmra.mrb[4].mxu1 %v2794_v59 }
 0x16b   : > { %v3318_v34 = vpop.f32.mrb[0].mxu0 }
 0x16c   : > { %v2404_v35 = vpop.f32.mrb[1].mxu0 }
 0x16d   : > { %v3319_v24 = vpop.f32.mrb[2].mxu0 }
 0x16e   : > { %v2407_v55 = vpop.f32.mrb[3].mxu0 }
 0x173   : > { %v3322_v13 = vpop.f32.mrb[4].mxu0 }
 0x174   : > { %v2420_v39 = vpop.f32.mrb[5].mxu0 }
 0x175   : > { %v3323_v43 = vpop.f32.mrb[6].mxu0 }
 0x176   : > { %v2423_v15 = vpop.f32.mrb[7].mxu0 }
 0x17a   : > { %v3212_v47 = vpop.f32.mrb[0].mxu1 }
 0x17b   : > { %v3324_v41 = vadd.f32 %v3318_v34, %v3212_v47  ;;  %v1412_v21 = vpop.f32.mrb[1].mxu1 }
 0x17c   : > { %v3325_v42 = vadd.f32 %v2404_v35, %v1412_v21  ;;  %v3213_v37 = vpop.f32.mrb[2].mxu1 }
 0x17d   : > { %v2452_v51 = vadd.f32 %v3324_v41, %v2979_v30  ;;  %v3326_v26 = vadd.f32 %v3319_v24, %v3213_v37  ;;  %v1415_v45 = vpop.f32.mrb[3].mxu1 }
 0x17e   : > { %v2450_v17 = vadd.f32 %v3325_v42, %v2979_v30  ;;  %v3327_v46 = vadd.f32 %v2407_v55, %v1415_v45 }
 0x17f   : > { %v2467_v6 = vadd.f32 %v2980_v40, %v2452_v51  ;;  %v2453_v2 = vadd.f32 %v3326_v26, %v2979_v30 }
 0x180   : > { %v2465_v58 = vadd.f32 %v2980_v40, %v2450_v17  ;;  %v2451_v48 = vadd.f32 %v3327_v46, %v2979_v30 }
 0x181   : > { %v2475_v50 = vmax.f32 %v2467_v6, 0.0  ;;  %v2468_v20 = vadd.f32 %v2980_v40, %v2453_v2 }
 0x182   : > { %v2473_v11 = vmax.f32 %v2465_v58, 0.0  ;;  %v2466_v32 = vadd.f32 %v2980_v40, %v2451_v48  ;;  %v3216_v61 = vpop.f32.mrb[4].mxu1 }
 0x183   : > { %2483 = vst [vmem:[%s4222_s8 + $0x10] sm:$0xff] %v2475_v50  ;;  %v2476_v62 = vmax.f32 %v2468_v20, 0.0  ;;  %v3328_v63 = vadd.f32 %v3322_v13, %v3216_v61  ;;  %v1428_v33 = vpop.f32.mrb[5].mxu1 }
 0x184   : > { %2481 = vst [vmem:[%s4222_s8] sm:$0xff] %v2473_v11  ;;  %v2474_v1 = vmax.f32 %v2466_v32, 0.0  ;;  %v3329_v60 = vadd.f32 %v2420_v39, %v1428_v33  ;;  %v3217_v52 = vpop.f32.mrb[6].mxu1 }
 0x185   : > { %2484 = vst [vmem:[%s4222_s8 + $0x18] sm:$0xff] %v2476_v62  ;;  %v2456_v3 = vadd.f32 %v3328_v63, %v2979_v30  ;;  %v3330_v5 = vadd.f32 %v3323_v43, %v3217_v52  ;;  %v1431_v28 = vpop.f32.mrb[7].mxu1 }
 0x186   : > { %2482 = vst [vmem:[%s4222_s8 + $0x8] sm:$0xff] %v2474_v1  ;;  %v2454_v18 = vadd.f32 %v3329_v60, %v2979_v30  ;;  %v3331_v27 = vadd.f32 %v2423_v15, %v1431_v28 }
 0x187   : > { %v2471_v16 = vadd.f32 %v2980_v40, %v2456_v3  ;;  %v2457_v7 = vadd.f32 %v3330_v5, %v2979_v30 }
 0x188   : > { %v2469_v4 = vadd.f32 %v2980_v40, %v2454_v18  ;;  %v2455_v12 = vadd.f32 %v3331_v27, %v2979_v30 }
 0x189   : > { %v2479_v19 = vmax.f32 %v2471_v16, 0.0  ;;  %v2472_v22 = vadd.f32 %v2980_v40, %v2457_v7 }
 0x18a   : > { %v2477_v38 = vmax.f32 %v2469_v4, 0.0  ;;  %v2470_v44 = vadd.f32 %v2980_v40, %v2455_v12 }
 0x18b   : > { %2487 = vst [vmem:[%s4222_s8 + $0x30] sm:$0xff] %v2479_v19  ;;  %v2480_v56 = vmax.f32 %v2472_v22, 0.0 }
 0x18c   : > { %2485 = vst [vmem:[%s4222_s8 + $0x20] sm:$0xff] %v2477_v38  ;;  %v2478_v49 = vmax.f32 %v2470_v44, 0.0 }
 0x18d   : > { %2488 = vst [vmem:[%s4222_s8 + $0x38] sm:$0xff] %v2480_v56 }
 0x18e   : > { %2486 = vst [vmem:[%s4222_s8 + $0x28] sm:$0xff] %v2478_v49 }
 0x18f PF: > { %s16_s23 = sadd.s32 1, %s3533_s23   ;;  %s4252_s21 = smov %s3529_s22 }
 0x190   : > { %p13_p5 = scmp.ge.s32.totalorder %s16_s23, 4   ;;  %s4253_s22 = smov %s4255_s24 }
 0x192   :  { %15 = sbr.rel (!%p13_p5) target bundleno = 2 (0x2), region = 99 }

</bundles_post_ra>
